<compile_context>
chip_gen: v7x
topology: tpu7x:2x2x1
jax: 0.10.0
libtpu: 0.0.40
codegen_flags: <defaults>
</compile_context>

<pallas_src>
import functools

import jax
import jax.numpy as jnp
from jax import lax
from jax.experimental import pallas as pl
from jax.experimental.pallas import tpu as pltpu


# ----------------------------- Pallas kernel --------------------------------


def _lstm_mlp_kernel(
    x_ref,
    wih1_ref, whh1_ref, b1_ref,
    wih2_ref, whh2_ref, b2_ref,
    wfc1_ref, bfc1_ref,
    wfc2_ref, bfc2_ref,
    wfc3_ref, bfc3_ref,
    out_ref,
    gates1_ref, h1_all_ref, gates2_ref, h2_all_ref,
):
    seq_len = x_ref.shape[0]
    h1_dim = whh1_ref.shape[0]
    h2_dim = whh2_ref.shape[0]

    def lstm_gates(pre, c, hid):
        # PyTorch gate order: i, f, g, o
        i_g = jax.nn.sigmoid(pre[:, 0 * hid:1 * hid])
        f_g = jax.nn.sigmoid(pre[:, 1 * hid:2 * hid])
        g_g = jnp.tanh(pre[:, 2 * hid:3 * hid])
        o_g = jax.nn.sigmoid(pre[:, 3 * hid:4 * hid])
        c_new = f_g * c + i_g * g_g
        h_new = o_g * jnp.tanh(c_new)
        return h_new, c_new

    # ---- Pass 1: batched layer-1 input projection (off the recurrence chain) ----
    gates1_ref[...] = (
        jnp.dot(x_ref[...], wih1_ref[...], preferred_element_type=jnp.float32)
        + b1_ref[...]
    )

    # ---- Pass 2: lstm1 recurrence -- only h @ W_hh1 per step on the serial path ----
    whh1 = whh1_ref[...]

    def step1(t, carry):
        h, c = carry
        pre = gates1_ref[pl.ds(t, 1), :] + jnp.dot(
            h, whh1, preferred_element_type=jnp.float32)
        h, c = lstm_gates(pre, c, h1_dim)
        h1_all_ref[pl.ds(t, 1), :] = h
        return h, c

    lax.fori_loop(
        0, seq_len, step1,
        (jnp.zeros((1, h1_dim), jnp.float32),
         jnp.zeros((1, h1_dim), jnp.float32)),
        unroll=True)

    # ---- Pass 3: batched layer-2 input projection ----
    gates2_ref[...] = (
        jnp.dot(h1_all_ref[...], wih2_ref[...], preferred_element_type=jnp.float32)
        + b2_ref[...]
    )

    # ---- Pass 4: lstm2 recurrence ----
    whh2 = whh2_ref[...]

    def step2(t, carry):
        h, c = carry
        pre = gates2_ref[pl.ds(t, 1), :] + jnp.dot(
            h, whh2, preferred_element_type=jnp.float32)
        h, c = lstm_gates(pre, c, h2_dim)
        h2_all_ref[pl.ds(t, 1), :] = h
        return h, c

    lax.fori_loop(
        0, seq_len, step2,
        (jnp.zeros((1, h2_dim), jnp.float32),
         jnp.zeros((1, h2_dim), jnp.float32)),
        unroll=True)

    # ---- Pass 5: MLP head, fully batched over the sequence, single output store ----
    y = jnp.maximum(
        jnp.dot(h2_all_ref[...], wfc1_ref[...], preferred_element_type=jnp.float32)
        + bfc1_ref[...], 0.0)
    # Dropout: identity (inference mode).
    y = jnp.maximum(
        jnp.dot(y, wfc2_ref[...], preferred_element_type=jnp.float32)
        + bfc2_ref[...], 0.0)
    out_ref[...] = (
        jnp.dot(y, wfc3_ref[...], preferred_element_type=jnp.float32)
        + bfc3_ref[...]
    )


# ------------------------------ wrapper --------------------------------------


@jax.jit
def temporal_lstm_combined_channels(x, params):
    """x: (seq_len, input_dim) f32  ->  (seq_len, 1) f32."""
    seq_len = x.shape[0]
    h1 = params["w_hh1"].shape[0]
    h2 = params["w_hh2"].shape[0]

    args = (
        x,
        params["w_ih1"], params["w_hh1"], params["b1"],
        params["w_ih2"], params["w_hh2"], params["b2"],
        params["w_fc1"], params["b_fc1"],
        params["w_fc2"], params["b_fc2"],
        params["w_fc3"], params["b_fc3"],
    )
    vmem = pl.BlockSpec(memory_space=pltpu.MemorySpace.VMEM)
    return pl.pallas_call(
        _lstm_mlp_kernel,
        out_shape=jax.ShapeDtypeStruct((seq_len, 1), jnp.float32),
        in_specs=[vmem] * len(args),
        out_specs=vmem,
        scratch_shapes=[
            pltpu.VMEM((seq_len, 4 * h1), jnp.float32),   # layer-1 input pre-activations
            pltpu.VMEM((seq_len, h1), jnp.float32),       # all h1 outputs
            pltpu.VMEM((seq_len, 4 * h2), jnp.float32),   # layer-2 input pre-activations
            pltpu.VMEM((seq_len, h2), jnp.float32),       # all h2 outputs
        ],
        # Total live data is well under 1 MiB; 8 MiB leaves headroom on all generations
        # (v7x TC only has 64 MiB total VMEM).
        compiler_params=pltpu.CompilerParams(vmem_limit_bytes=8 << 20),
    )(*args)


# --------------------------- parameter setup ----------------------------------


def init_params(key, input_dim, h1, h2, fc2_dim):
    """Deterministic synthetic parameters (PyTorch-style init, pre-transposed)."""
    ks = jax.random.split(key, 13)

    def u(k, shape, scale):
        return jax.random.uniform(k, shape, jnp.float32, -scale, scale)

    s1 = 1.0 / jnp.sqrt(h1)
    s2 = 1.0 / jnp.sqrt(h2)
    sf1 = 1.0 / jnp.sqrt(h2)
    sf2 = 1.0 / jnp.sqrt(fc2_dim)

    params = {
        # lstm1: PyTorch weight_ih (4*h1, input_dim) -> stored transposed (input_dim, 4*h1)
        "w_ih1": u(ks[0], (input_dim, 4 * h1), s1),
        "w_hh1": u(ks[1], (h1, 4 * h1), s1),
        # combined bias b_ih + b_hh, kept 2D for TPU layout
        "b1": u(ks[2], (1, 4 * h1), s1) + u(ks[3], (1, 4 * h1), s1),
        # lstm2
        "w_ih2": u(ks[4], (h1, 4 * h2), s2),
        "w_hh2": u(ks[5], (h2, 4 * h2), s2),
        "b2": u(ks[6], (1, 4 * h2), s2) + u(ks[7], (1, 4 * h2), s2),
        # fc1: (h2, h2)
        "w_fc1": u(ks[8], (h2, h2), sf1),
        "b_fc1": u(ks[9], (1, h2), sf1),
        # fc2: (h2, fc2_dim)
        "w_fc2": u(ks[10], (h2, fc2_dim), sf1),
        "b_fc2": u(ks[11], (1, fc2_dim), sf1),
        # fc3: (fc2_dim, 1)
        "w_fc3": u(ks[12], (fc2_dim, 1), sf2),
        "b_fc3": jnp.zeros((1, 1), jnp.float32),
    }
    return params


# ------------------------------ reference -------------------------------------


def reference_forward(x, p, h1_dim, h2_dim):
    def lstm_layer(xs, w_ih, w_hh, b, hid):
        def cell(carry, x_t):
            h, c = carry
            gates = x_t @ w_ih + h @ w_hh + b[0]
            i_g = jax.nn.sigmoid(gates[0 * hid:1 * hid])
            f_g = jax.nn.sigmoid(gates[1 * hid:2 * hid])
            g_g = jnp.tanh(gates[2 * hid:3 * hid])
            o_g = jax.nn.sigmoid(gates[3 * hid:4 * hid])
            c_new = f_g * c + i_g * g_g
            h_new = o_g * jnp.tanh(c_new)
            return (h_new, c_new), h_new

        init = (jnp.zeros((hid,), jnp.float32), jnp.zeros((hid,), jnp.float32))
        _, hs = lax.scan(cell, init, xs)
        return hs

    out = lstm_layer(x, p["w_ih1"], p["w_hh1"], p["b1"], h1_dim)
    out = lstm_layer(out, p["w_ih2"], p["w_hh2"], p["b2"], h2_dim)
    out = jnp.maximum(out @ p["w_fc1"] + p["b_fc1"], 0.0)
    out = jnp.maximum(out @ p["w_fc2"] + p["b_fc2"], 0.0)
    out = out @ p["w_fc3"] + p["b_fc3"]
    return out


# ------------------------------ main ------------------------------------------

if __name__ == "__main__":
    SEQ_LEN = 8
    INPUT_DIM = 64
    H1, H2 = 64, 32
    FC2_DIM = 16

    key = jax.random.PRNGKey(0)
    k_x, k_p = jax.random.split(key)

    x = jax.random.normal(k_x, (SEQ_LEN, INPUT_DIM), jnp.float32)
    params = init_params(k_p, INPUT_DIM, H1, H2, FC2_DIM)

    out = temporal_lstm_combined_channels(x, params)
    out = jax.block_until_ready(out)
    assert out.shape == (SEQ_LEN, 1), out.shape

    ref = reference_forward(x, params, H1, H2)
    assert jnp.allclose(out, ref, atol=1e-3, rtol=1e-3), (out, ref)

    print("KERNEL_OK")
</pallas_src>

<mosaic_0001>
module attributes {stable_mosaic.version = 11 : i64} {
  func.func @_lstm_mlp_kernel(%arg0: memref<8x64xf32, #tpu.memory_space<vmem>>, %arg1: memref<64x256xf32, #tpu.memory_space<vmem>>, %arg2: memref<64x256xf32, #tpu.memory_space<vmem>>, %arg3: memref<1x256xf32, #tpu.memory_space<vmem>>, %arg4: memref<64x128xf32, #tpu.memory_space<vmem>>, %arg5: memref<32x128xf32, #tpu.memory_space<vmem>>, %arg6: memref<1x128xf32, #tpu.memory_space<vmem>>, %arg7: memref<32x32xf32, #tpu.memory_space<vmem>>, %arg8: memref<1x32xf32, #tpu.memory_space<vmem>>, %arg9: memref<32x16xf32, #tpu.memory_space<vmem>>, %arg10: memref<1x16xf32, #tpu.memory_space<vmem>>, %arg11: memref<16x1xf32, #tpu.memory_space<vmem>>, %arg12: memref<1x1xf32, #tpu.memory_space<vmem>>, %arg13: memref<8x1xf32, #tpu.memory_space<vmem>>, %arg14: memref<8x256xf32, #tpu.memory_space<vmem>>, %arg15: memref<8x64xf32, #tpu.memory_space<vmem>>, %arg16: memref<8x128xf32, #tpu.memory_space<vmem>>, %arg17: memref<8x32xf32, #tpu.memory_space<vmem>>) attributes {dimension_semantics = [], scalar_prefetch = 0 : i64, scratch_operands = 4 : i64, tpu.core_type = #tpu.core_type<tc>} {
    %c0 = arith.constant 0 : index
    %c0_0 = arith.constant 0 : index
    %0 = vector.load %arg0[%c0, %c0_0] : memref<8x64xf32, #tpu.memory_space<vmem>>, vector<8x64xf32>
    %c0_1 = arith.constant 0 : index
    %c0_2 = arith.constant 0 : index
    %1 = vector.load %arg1[%c0_1, %c0_2] : memref<64x256xf32, #tpu.memory_space<vmem>>, vector<64x256xf32>
    %cst = arith.constant dense<0.000000e+00> : vector<8x256xf32>
    %2 = tpu.matmul %0, %1, %cst {dimension_numbers = #tpu.dot_dimension_numbers<[1], [0], [0], [1], [0, 0, 1, 1], [], []>} : vector<8x64xf32>, vector<64x256xf32>, vector<8x256xf32> -> vector<8x256xf32>
    %c0_3 = arith.constant 0 : index
    %c0_4 = arith.constant 0 : index
    %3 = vector.load %arg3[%c0_3, %c0_4] : memref<1x256xf32, #tpu.memory_space<vmem>>, vector<1x256xf32>
    %4 = vector.broadcast %3 : vector<1x256xf32> to vector<8x256xf32>
    %5 = arith.addf %2, %4 : vector<8x256xf32>
    %c0_5 = arith.constant 0 : index
    %c0_6 = arith.constant 0 : index
    %6 = vector.load %arg14[%c0_5, %c0_6] : memref<8x256xf32, #tpu.memory_space<vmem>>, vector<8x256xf32>
    tpu.vector_store %arg14[%c0_5, %c0_6], %5 {strides = array<i32>} : memref<8x256xf32, #tpu.memory_space<vmem>>, vector<8x256xf32>,
    %c0_7 = arith.constant 0 : index
    %c0_8 = arith.constant 0 : index
    %7 = vector.load %arg2[%c0_7, %c0_8] : memref<64x256xf32, #tpu.memory_space<vmem>>, vector<64x256xf32>
    %cst_9 = arith.constant 0.000000e+00 : f32
    %8 = vector.broadcast %cst_9 : f32 to vector<1x64xf32>
    %cst_10 = arith.constant 0.000000e+00 : f32
    %9 = vector.broadcast %cst_10 : f32 to vector<1x64xf32>
    %c0_i32 = arith.constant 0 : i32
    %10 = arith.index_cast %c0_i32 : i32 to index
    %c0_11 = arith.constant 0 : index
    %11 = vector.load %arg14[%10, %c0_11] : memref<8x256xf32, #tpu.memory_space<vmem>>, vector<1x256xf32>
    %cst_12 = arith.constant dense<0.000000e+00> : vector<1x256xf32>
    %12 = tpu.matmul %8, %7, %cst_12 {dimension_numbers = #tpu.dot_dimension_numbers<[1], [0], [0], [1], [0, 0, 1, 1], [], []>} : vector<1x64xf32>, vector<64x256xf32>, vector<1x256xf32> -> vector<1x256xf32>
    %13 = arith.addf %11, %12 : vector<1x256xf32>
    %14 = vector.extract_strided_slice %13 {offsets = [0, 0], sizes = [1, 64], strides = [1, 1]} : vector<1x256xf32> to vector<1x64xf32>
    %15 = arith.negf %14 : vector<1x64xf32>
    %16 = math.exp %15 : vector<1x64xf32>
    %cst_13 = arith.constant 1.000000e+00 : f32
    %17 = vector.broadcast %cst_13 : f32 to vector<1x64xf32>
    %18 = arith.addf %17, %16 : vector<1x64xf32>
    %19 = arith.divf %17, %18 : vector<1x64xf32>
    %20 = vector.extract_strided_slice %13 {offsets = [0, 64], sizes = [1, 64], strides = [1, 1]} : vector<1x256xf32> to vector<1x64xf32>
    %21 = arith.negf %20 : vector<1x64xf32>
    %22 = math.exp %21 : vector<1x64xf32>
    %cst_14 = arith.constant 1.000000e+00 : f32
    %23 = vector.broadcast %cst_14 : f32 to vector<1x64xf32>
    %24 = arith.addf %23, %22 : vector<1x64xf32>
    %25 = arith.divf %23, %24 : vector<1x64xf32>
    %26 = vector.extract_strided_slice %13 {offsets = [0, 128], sizes = [1, 64], strides = [1, 1]} : vector<1x256xf32> to vector<1x64xf32>
    %27 = math.tanh %26 : vector<1x64xf32>
    %28 = vector.extract_strided_slice %13 {offsets = [0, 192], sizes = [1, 64], strides = [1, 1]} : vector<1x256xf32> to vector<1x64xf32>
    %29 = arith.negf %28 : vector<1x64xf32>
    %30 = math.exp %29 : vector<1x64xf32>
    %cst_15 = arith.constant 1.000000e+00 : f32
    %31 = vector.broadcast %cst_15 : f32 to vector<1x64xf32>
    %32 = arith.addf %31, %30 : vector<1x64xf32>
    %33 = arith.divf %31, %32 : vector<1x64xf32>
    %34 = arith.mulf %25, %9 : vector<1x64xf32>
    %35 = arith.mulf %19, %27 : vector<1x64xf32>
    %36 = arith.addf %34, %35 : vector<1x64xf32>
    %37 = math.tanh %36 : vector<1x64xf32>
    %38 = arith.mulf %33, %37 : vector<1x64xf32>
    %39 = arith.index_cast %c0_i32 : i32 to index
    %c0_16 = arith.constant 0 : index
    %40 = vector.load %arg15[%39, %c0_16] : memref<8x64xf32, #tpu.memory_space<vmem>>, vector<1x64xf32>
    tpu.vector_store %arg15[%39, %c0_16], %38 {strides = array<i32>} : memref<8x64xf32, #tpu.memory_space<vmem>>, vector<1x64xf32>,
    %c1_i32 = arith.constant 1 : i32
    %41 = arith.index_cast %c1_i32 : i32 to index
    %c0_17 = arith.constant 0 : index
    %42 = vector.load %arg14[%41, %c0_17] : memref<8x256xf32, #tpu.memory_space<vmem>>, vector<1x256xf32>
    %cst_18 = arith.constant dense<0.000000e+00> : vector<1x256xf32>
    %43 = tpu.matmul %38, %7, %cst_18 {dimension_numbers = #tpu.dot_dimension_numbers<[1], [0], [0], [1], [0, 0, 1, 1], [], []>} : vector<1x64xf32>, vector<64x256xf32>, vector<1x256xf32> -> vector<1x256xf32>
    %44 = arith.addf %42, %43 : vector<1x256xf32>
    %45 = vector.extract_strided_slice %44 {offsets = [0, 0], sizes = [1, 64], strides = [1, 1]} : vector<1x256xf32> to vector<1x64xf32>
    %46 = arith.negf %45 : vector<1x64xf32>
    %47 = math.exp %46 : vector<1x64xf32>
    %cst_19 = arith.constant 1.000000e+00 : f32
    %48 = vector.broadcast %cst_19 : f32 to vector<1x64xf32>
    %49 = arith.addf %48, %47 : vector<1x64xf32>
    %50 = arith.divf %48, %49 : vector<1x64xf32>
    %51 = vector.extract_strided_slice %44 {offsets = [0, 64], sizes = [1, 64], strides = [1, 1]} : vector<1x256xf32> to vector<1x64xf32>
    %52 = arith.negf %51 : vector<1x64xf32>
    %53 = math.exp %52 : vector<1x64xf32>
    %cst_20 = arith.constant 1.000000e+00 : f32
    %54 = vector.broadcast %cst_20 : f32 to vector<1x64xf32>
    %55 = arith.addf %54, %53 : vector<1x64xf32>
    %56 = arith.divf %54, %55 : vector<1x64xf32>
    %57 = vector.extract_strided_slice %44 {offsets = [0, 128], sizes = [1, 64], strides = [1, 1]} : vector<1x256xf32> to vector<1x64xf32>
    %58 = math.tanh %57 : vector<1x64xf32>
    %59 = vector.extract_strided_slice %44 {offsets = [0, 192], sizes = [1, 64], strides = [1, 1]} : vector<1x256xf32> to vector<1x64xf32>
    %60 = arith.negf %59 : vector<1x64xf32>
    %61 = math.exp %60 : vector<1x64xf32>
    %cst_21 = arith.constant 1.000000e+00 : f32
    %62 = vector.broadcast %cst_21 : f32 to vector<1x64xf32>
    %63 = arith.addf %62, %61 : vector<1x64xf32>
    %64 = arith.divf %62, %63 : vector<1x64xf32>
    %65 = arith.mulf %56, %36 : vector<1x64xf32>
    %66 = arith.mulf %50, %58 : vector<1x64xf32>
    %67 = arith.addf %65, %66 : vector<1x64xf32>
    %68 = math.tanh %67 : vector<1x64xf32>
    %69 = arith.mulf %64, %68 : vector<1x64xf32>
    %70 = arith.index_cast %c1_i32 : i32 to index
    %c0_22 = arith.constant 0 : index
    %71 = vector.load %arg15[%70, %c0_22] : memref<8x64xf32, #tpu.memory_space<vmem>>, vector<1x64xf32>
    tpu.vector_store %arg15[%70, %c0_22], %69 {strides = array<i32>} : memref<8x64xf32, #tpu.memory_space<vmem>>, vector<1x64xf32>,
    %c2_i32 = arith.constant 2 : i32
    %72 = arith.index_cast %c2_i32 : i32 to index
    %c0_23 = arith.constant 0 : index
    %73 = vector.load %arg14[%72, %c0_23] : memref<8x256xf32, #tpu.memory_space<vmem>>, vector<1x256xf32>
    %cst_24 = arith.constant dense<0.000000e+00> : vector<1x256xf32>
    %74 = tpu.matmul %69, %7, %cst_24 {dimension_numbers = #tpu.dot_dimension_numbers<[1], [0], [0], [1], [0, 0, 1, 1], [], []>} : vector<1x64xf32>, vector<64x256xf32>, vector<1x256xf32> -> vector<1x256xf32>
    %75 = arith.addf %73, %74 : vector<1x256xf32>
    %76 = vector.extract_strided_slice %75 {offsets = [0, 0], sizes = [1, 64], strides = [1, 1]} : vector<1x256xf32> to vector<1x64xf32>
    %77 = arith.negf %76 : vector<1x64xf32>
    %78 = math.exp %77 : vector<1x64xf32>
    %cst_25 = arith.constant 1.000000e+00 : f32
    %79 = vector.broadcast %cst_25 : f32 to vector<1x64xf32>
    %80 = arith.addf %79, %78 : vector<1x64xf32>
    %81 = arith.divf %79, %80 : vector<1x64xf32>
    %82 = vector.extract_strided_slice %75 {offsets = [0, 64], sizes = [1, 64], strides = [1, 1]} : vector<1x256xf32> to vector<1x64xf32>
    %83 = arith.negf %82 : vector<1x64xf32>
    %84 = math.exp %83 : vector<1x64xf32>
    %cst_26 = arith.constant 1.000000e+00 : f32
    %85 = vector.broadcast %cst_26 : f32 to vector<1x64xf32>
    %86 = arith.addf %85, %84 : vector<1x64xf32>
    %87 = arith.divf %85, %86 : vector<1x64xf32>
    %88 = vector.extract_strided_slice %75 {offsets = [0, 128], sizes = [1, 64], strides = [1, 1]} : vector<1x256xf32> to vector<1x64xf32>
    %89 = math.tanh %88 : vector<1x64xf32>
    %90 = vector.extract_strided_slice %75 {offsets = [0, 192], sizes = [1, 64], strides = [1, 1]} : vector<1x256xf32> to vector<1x64xf32>
    %91 = arith.negf %90 : vector<1x64xf32>
    %92 = math.exp %91 : vector<1x64xf32>
    %cst_27 = arith.constant 1.000000e+00 : f32
    %93 = vector.broadcast %cst_27 : f32 to vector<1x64xf32>
    %94 = arith.addf %93, %92 : vector<1x64xf32>
    %95 = arith.divf %93, %94 : vector<1x64xf32>
    %96 = arith.mulf %87, %67 : vector<1x64xf32>
    %97 = arith.mulf %81, %89 : vector<1x64xf32>
    %98 = arith.addf %96, %97 : vector<1x64xf32>
    %99 = math.tanh %98 : vector<1x64xf32>
    %100 = arith.mulf %95, %99 : vector<1x64xf32>
    %101 = arith.index_cast %c2_i32 : i32 to index
    %c0_28 = arith.constant 0 : index
    %102 = vector.load %arg15[%101, %c0_28] : memref<8x64xf32, #tpu.memory_space<vmem>>, vector<1x64xf32>
    tpu.vector_store %arg15[%101, %c0_28], %100 {strides = array<i32>} : memref<8x64xf32, #tpu.memory_space<vmem>>, vector<1x64xf32>,
    %c3_i32 = arith.constant 3 : i32
    %103 = arith.index_cast %c3_i32 : i32 to index
    %c0_29 = arith.constant 0 : index
    %104 = vector.load %arg14[%103, %c0_29] : memref<8x256xf32, #tpu.memory_space<vmem>>, vector<1x256xf32>
    %cst_30 = arith.constant dense<0.000000e+00> : vector<1x256xf32>
    %105 = tpu.matmul %100, %7, %cst_30 {dimension_numbers = #tpu.dot_dimension_numbers<[1], [0], [0], [1], [0, 0, 1, 1], [], []>} : vector<1x64xf32>, vector<64x256xf32>, vector<1x256xf32> -> vector<1x256xf32>
    %106 = arith.addf %104, %105 : vector<1x256xf32>
    %107 = vector.extract_strided_slice %106 {offsets = [0, 0], sizes = [1, 64], strides = [1, 1]} : vector<1x256xf32> to vector<1x64xf32>
    %108 = arith.negf %107 : vector<1x64xf32>
    %109 = math.exp %108 : vector<1x64xf32>
    %cst_31 = arith.constant 1.000000e+00 : f32
    %110 = vector.broadcast %cst_31 : f32 to vector<1x64xf32>
    %111 = arith.addf %110, %109 : vector<1x64xf32>
    %112 = arith.divf %110, %111 : vector<1x64xf32>
    %113 = vector.extract_strided_slice %106 {offsets = [0, 64], sizes = [1, 64], strides = [1, 1]} : vector<1x256xf32> to vector<1x64xf32>
    %114 = arith.negf %113 : vector<1x64xf32>
    %115 = math.exp %114 : vector<1x64xf32>
    %cst_32 = arith.constant 1.000000e+00 : f32
    %116 = vector.broadcast %cst_32 : f32 to vector<1x64xf32>
    %117 = arith.addf %116, %115 : vector<1x64xf32>
    %118 = arith.divf %116, %117 : vector<1x64xf32>
    %119 = vector.extract_strided_slice %106 {offsets = [0, 128], sizes = [1, 64], strides = [1, 1]} : vector<1x256xf32> to vector<1x64xf32>
    %120 = math.tanh %119 : vector<1x64xf32>
    %121 = vector.extract_strided_slice %106 {offsets = [0, 192], sizes = [1, 64], strides = [1, 1]} : vector<1x256xf32> to vector<1x64xf32>
    %122 = arith.negf %121 : vector<1x64xf32>
    %123 = math.exp %122 : vector<1x64xf32>
    %cst_33 = arith.constant 1.000000e+00 : f32
    %124 = vector.broadcast %cst_33 : f32 to vector<1x64xf32>
    %125 = arith.addf %124, %123 : vector<1x64xf32>
    %126 = arith.divf %124, %125 : vector<1x64xf32>
    %127 = arith.mulf %118, %98 : vector<1x64xf32>
    %128 = arith.mulf %112, %120 : vector<1x64xf32>
    %129 = arith.addf %127, %128 : vector<1x64xf32>
    %130 = math.tanh %129 : vector<1x64xf32>
    %131 = arith.mulf %126, %130 : vector<1x64xf32>
    %132 = arith.index_cast %c3_i32 : i32 to index
    %c0_34 = arith.constant 0 : index
    %133 = vector.load %arg15[%132, %c0_34] : memref<8x64xf32, #tpu.memory_space<vmem>>, vector<1x64xf32>
    tpu.vector_store %arg15[%132, %c0_34], %131 {strides = array<i32>} : memref<8x64xf32, #tpu.memory_space<vmem>>, vector<1x64xf32>,
    %c4_i32 = arith.constant 4 : i32
    %134 = arith.index_cast %c4_i32 : i32 to index
    %c0_35 = arith.constant 0 : index
    %135 = vector.load %arg14[%134, %c0_35] : memref<8x256xf32, #tpu.memory_space<vmem>>, vector<1x256xf32>
    %cst_36 = arith.constant dense<0.000000e+00> : vector<1x256xf32>
    %136 = tpu.matmul %131, %7, %cst_36 {dimension_numbers = #tpu.dot_dimension_numbers<[1], [0], [0], [1], [0, 0, 1, 1], [], []>} : vector<1x64xf32>, vector<64x256xf32>, vector<1x256xf32> -> vector<1x256xf32>
    %137 = arith.addf %135, %136 : vector<1x256xf32>
    %138 = vector.extract_strided_slice %137 {offsets = [0, 0], sizes = [1, 64], strides = [1, 1]} : vector<1x256xf32> to vector<1x64xf32>
    %139 = arith.negf %138 : vector<1x64xf32>
    %140 = math.exp %139 : vector<1x64xf32>
    %cst_37 = arith.constant 1.000000e+00 : f32
    %141 = vector.broadcast %cst_37 : f32 to vector<1x64xf32>
    %142 = arith.addf %141, %140 : vector<1x64xf32>
    %143 = arith.divf %141, %142 : vector<1x64xf32>
    %144 = vector.extract_strided_slice %137 {offsets = [0, 64], sizes = [1, 64], strides = [1, 1]} : vector<1x256xf32> to vector<1x64xf32>
    %145 = arith.negf %144 : vector<1x64xf32>
    %146 = math.exp %145 : vector<1x64xf32>
    %cst_38 = arith.constant 1.000000e+00 : f32
    %147 = vector.broadcast %cst_38 : f32 to vector<1x64xf32>
    %148 = arith.addf %147, %146 : vector<1x64xf32>
    %149 = arith.divf %147, %148 : vector<1x64xf32>
    %150 = vector.extract_strided_slice %137 {offsets = [0, 128], sizes = [1, 64], strides = [1, 1]} : vector<1x256xf32> to vector<1x64xf32>
    %151 = math.tanh %150 : vector<1x64xf32>
    %152 = vector.extract_strided_slice %137 {offsets = [0, 192], sizes = [1, 64], strides = [1, 1]} : vector<1x256xf32> to vector<1x64xf32>
    %153 = arith.negf %152 : vector<1x64xf32>
    %154 = math.exp %153 : vector<1x64xf32>
    %cst_39 = arith.constant 1.000000e+00 : f32
    %155 = vector.broadcast %cst_39 : f32 to vector<1x64xf32>
    %156 = arith.addf %155, %154 : vector<1x64xf32>
    %157 = arith.divf %155, %156 : vector<1x64xf32>
    %158 = arith.mulf %149, %129 : vector<1x64xf32>
    %159 = arith.mulf %143, %151 : vector<1x64xf32>
    %160 = arith.addf %158, %159 : vector<1x64xf32>
    %161 = math.tanh %160 : vector<1x64xf32>
    %162 = arith.mulf %157, %161 : vector<1x64xf32>
    %163 = arith.index_cast %c4_i32 : i32 to index
    %c0_40 = arith.constant 0 : index
    %164 = vector.load %arg15[%163, %c0_40] : memref<8x64xf32, #tpu.memory_space<vmem>>, vector<1x64xf32>
    tpu.vector_store %arg15[%163, %c0_40], %162 {strides = array<i32>} : memref<8x64xf32, #tpu.memory_space<vmem>>, vector<1x64xf32>,
    %c5_i32 = arith.constant 5 : i32
    %165 = arith.index_cast %c5_i32 : i32 to index
    %c0_41 = arith.constant 0 : index
    %166 = vector.load %arg14[%165, %c0_41] : memref<8x256xf32, #tpu.memory_space<vmem>>, vector<1x256xf32>
    %cst_42 = arith.constant dense<0.000000e+00> : vector<1x256xf32>
    %167 = tpu.matmul %162, %7, %cst_42 {dimension_numbers = #tpu.dot_dimension_numbers<[1], [0], [0], [1], [0, 0, 1, 1], [], []>} : vector<1x64xf32>, vector<64x256xf32>, vector<1x256xf32> -> vector<1x256xf32>
    %168 = arith.addf %166, %167 : vector<1x256xf32>
    %169 = vector.extract_strided_slice %168 {offsets = [0, 0], sizes = [1, 64], strides = [1, 1]} : vector<1x256xf32> to vector<1x64xf32>
    %170 = arith.negf %169 : vector<1x64xf32>
    %171 = math.exp %170 : vector<1x64xf32>
    %cst_43 = arith.constant 1.000000e+00 : f32
    %172 = vector.broadcast %cst_43 : f32 to vector<1x64xf32>
    %173 = arith.addf %172, %171 : vector<1x64xf32>
    %174 = arith.divf %172, %173 : vector<1x64xf32>
    %175 = vector.extract_strided_slice %168 {offsets = [0, 64], sizes = [1, 64], strides = [1, 1]} : vector<1x256xf32> to vector<1x64xf32>
    %176 = arith.negf %175 : vector<1x64xf32>
    %177 = math.exp %176 : vector<1x64xf32>
    %cst_44 = arith.constant 1.000000e+00 : f32
    %178 = vector.broadcast %cst_44 : f32 to vector<1x64xf32>
    %179 = arith.addf %178, %177 : vector<1x64xf32>
    %180 = arith.divf %178, %179 : vector<1x64xf32>
    %181 = vector.extract_strided_slice %168 {offsets = [0, 128], sizes = [1, 64], strides = [1, 1]} : vector<1x256xf32> to vector<1x64xf32>
    %182 = math.tanh %181 : vector<1x64xf32>
    %183 = vector.extract_strided_slice %168 {offsets = [0, 192], sizes = [1, 64], strides = [1, 1]} : vector<1x256xf32> to vector<1x64xf32>
    %184 = arith.negf %183 : vector<1x64xf32>
    %185 = math.exp %184 : vector<1x64xf32>
    %cst_45 = arith.constant 1.000000e+00 : f32
    %186 = vector.broadcast %cst_45 : f32 to vector<1x64xf32>
    %187 = arith.addf %186, %185 : vector<1x64xf32>
    %188 = arith.divf %186, %187 : vector<1x64xf32>
    %189 = arith.mulf %180, %160 : vector<1x64xf32>
    %190 = arith.mulf %174, %182 : vector<1x64xf32>
    %191 = arith.addf %189, %190 : vector<1x64xf32>
    %192 = math.tanh %191 : vector<1x64xf32>
    %193 = arith.mulf %188, %192 : vector<1x64xf32>
    %194 = arith.index_cast %c5_i32 : i32 to index
    %c0_46 = arith.constant 0 : index
    %195 = vector.load %arg15[%194, %c0_46] : memref<8x64xf32, #tpu.memory_space<vmem>>, vector<1x64xf32>
    tpu.vector_store %arg15[%194, %c0_46], %193 {strides = array<i32>} : memref<8x64xf32, #tpu.memory_space<vmem>>, vector<1x64xf32>,
    %c6_i32 = arith.constant 6 : i32
    %196 = arith.index_cast %c6_i32 : i32 to index
    %c0_47 = arith.constant 0 : index
    %197 = vector.load %arg14[%196, %c0_47] : memref<8x256xf32, #tpu.memory_space<vmem>>, vector<1x256xf32>
    %cst_48 = arith.constant dense<0.000000e+00> : vector<1x256xf32>
    %198 = tpu.matmul %193, %7, %cst_48 {dimension_numbers = #tpu.dot_dimension_numbers<[1], [0], [0], [1], [0, 0, 1, 1], [], []>} : vector<1x64xf32>, vector<64x256xf32>, vector<1x256xf32> -> vector<1x256xf32>
    %199 = arith.addf %197, %198 : vector<1x256xf32>
    %200 = vector.extract_strided_slice %199 {offsets = [0, 0], sizes = [1, 64], strides = [1, 1]} : vector<1x256xf32> to vector<1x64xf32>
    %201 = arith.negf %200 : vector<1x64xf32>
    %202 = math.exp %201 : vector<1x64xf32>
    %cst_49 = arith.constant 1.000000e+00 : f32
    %203 = vector.broadcast %cst_49 : f32 to vector<1x64xf32>
    %204 = arith.addf %203, %202 : vector<1x64xf32>
    %205 = arith.divf %203, %204 : vector<1x64xf32>
    %206 = vector.extract_strided_slice %199 {offsets = [0, 64], sizes = [1, 64], strides = [1, 1]} : vector<1x256xf32> to vector<1x64xf32>
    %207 = arith.negf %206 : vector<1x64xf32>
    %208 = math.exp %207 : vector<1x64xf32>
    %cst_50 = arith.constant 1.000000e+00 : f32
    %209 = vector.broadcast %cst_50 : f32 to vector<1x64xf32>
    %210 = arith.addf %209, %208 : vector<1x64xf32>
    %211 = arith.divf %209, %210 : vector<1x64xf32>
    %212 = vector.extract_strided_slice %199 {offsets = [0, 128], sizes = [1, 64], strides = [1, 1]} : vector<1x256xf32> to vector<1x64xf32>
    %213 = math.tanh %212 : vector<1x64xf32>
    %214 = vector.extract_strided_slice %199 {offsets = [0, 192], sizes = [1, 64], strides = [1, 1]} : vector<1x256xf32> to vector<1x64xf32>
    %215 = arith.negf %214 : vector<1x64xf32>
    %216 = math.exp %215 : vector<1x64xf32>
    %cst_51 = arith.constant 1.000000e+00 : f32
    %217 = vector.broadcast %cst_51 : f32 to vector<1x64xf32>
    %218 = arith.addf %217, %216 : vector<1x64xf32>
    %219 = arith.divf %217, %218 : vector<1x64xf32>
    %220 = arith.mulf %211, %191 : vector<1x64xf32>
    %221 = arith.mulf %205, %213 : vector<1x64xf32>
    %222 = arith.addf %220, %221 : vector<1x64xf32>
    %223 = math.tanh %222 : vector<1x64xf32>
    %224 = arith.mulf %219, %223 : vector<1x64xf32>
    %225 = arith.index_cast %c6_i32 : i32 to index
    %c0_52 = arith.constant 0 : index
    %226 = vector.load %arg15[%225, %c0_52] : memref<8x64xf32, #tpu.memory_space<vmem>>, vector<1x64xf32>
    tpu.vector_store %arg15[%225, %c0_52], %224 {strides = array<i32>} : memref<8x64xf32, #tpu.memory_space<vmem>>, vector<1x64xf32>,
    %c7_i32 = arith.constant 7 : i32
    %227 = arith.index_cast %c7_i32 : i32 to index
    %c0_53 = arith.constant 0 : index
    %228 = vector.load %arg14[%227, %c0_53] : memref<8x256xf32, #tpu.memory_space<vmem>>, vector<1x256xf32>
    %cst_54 = arith.constant dense<0.000000e+00> : vector<1x256xf32>
    %229 = tpu.matmul %224, %7, %cst_54 {dimension_numbers = #tpu.dot_dimension_numbers<[1], [0], [0], [1], [0, 0, 1, 1], [], []>} : vector<1x64xf32>, vector<64x256xf32>, vector<1x256xf32> -> vector<1x256xf32>
    %230 = arith.addf %228, %229 : vector<1x256xf32>
    %231 = vector.extract_strided_slice %230 {offsets = [0, 0], sizes = [1, 64], strides = [1, 1]} : vector<1x256xf32> to vector<1x64xf32>
    %232 = arith.negf %231 : vector<1x64xf32>
    %233 = math.exp %232 : vector<1x64xf32>
    %cst_55 = arith.constant 1.000000e+00 : f32
    %234 = vector.broadcast %cst_55 : f32 to vector<1x64xf32>
    %235 = arith.addf %234, %233 : vector<1x64xf32>
    %236 = arith.divf %234, %235 : vector<1x64xf32>
    %237 = vector.extract_strided_slice %230 {offsets = [0, 64], sizes = [1, 64], strides = [1, 1]} : vector<1x256xf32> to vector<1x64xf32>
    %238 = arith.negf %237 : vector<1x64xf32>
    %239 = math.exp %238 : vector<1x64xf32>
    %cst_56 = arith.constant 1.000000e+00 : f32
    %240 = vector.broadcast %cst_56 : f32 to vector<1x64xf32>
    %241 = arith.addf %240, %239 : vector<1x64xf32>
    %242 = arith.divf %240, %241 : vector<1x64xf32>
    %243 = vector.extract_strided_slice %230 {offsets = [0, 128], sizes = [1, 64], strides = [1, 1]} : vector<1x256xf32> to vector<1x64xf32>
    %244 = math.tanh %243 : vector<1x64xf32>
    %245 = vector.extract_strided_slice %230 {offsets = [0, 192], sizes = [1, 64], strides = [1, 1]} : vector<1x256xf32> to vector<1x64xf32>
    %246 = arith.negf %245 : vector<1x64xf32>
    %247 = math.exp %246 : vector<1x64xf32>
    %cst_57 = arith.constant 1.000000e+00 : f32
    %248 = vector.broadcast %cst_57 : f32 to vector<1x64xf32>
    %249 = arith.addf %248, %247 : vector<1x64xf32>
    %250 = arith.divf %248, %249 : vector<1x64xf32>
    %251 = arith.mulf %242, %222 : vector<1x64xf32>
    %252 = arith.mulf %236, %244 : vector<1x64xf32>
    %253 = arith.addf %251, %252 : vector<1x64xf32>
    %254 = math.tanh %253 : vector<1x64xf32>
    %255 = arith.mulf %250, %254 : vector<1x64xf32>
    %256 = arith.index_cast %c7_i32 : i32 to index
    %c0_58 = arith.constant 0 : index
    %257 = vector.load %arg15[%256, %c0_58] : memref<8x64xf32, #tpu.memory_space<vmem>>, vector<1x64xf32>
    tpu.vector_store %arg15[%256, %c0_58], %255 {strides = array<i32>} : memref<8x64xf32, #tpu.memory_space<vmem>>, vector<1x64xf32>,
    %c8_i32 = arith.constant 8 : i32
    %c0_59 = arith.constant 0 : index
    %c0_60 = arith.constant 0 : index
    %258 = vector.load %arg15[%c0_59, %c0_60] : memref<8x64xf32, #tpu.memory_space<vmem>>, vector<8x64xf32>
    %c0_61 = arith.constant 0 : index
    %c0_62 = arith.constant 0 : index
    %259 = vector.load %arg4[%c0_61, %c0_62] : memref<64x128xf32, #tpu.memory_space<vmem>>, vector<64x128xf32>
    %cst_63 = arith.constant dense<0.000000e+00> : vector<8x128xf32>
    %260 = tpu.matmul %258, %259, %cst_63 {dimension_numbers = #tpu.dot_dimension_numbers<[1], [0], [0], [1], [0, 0, 1, 1], [], []>} : vector<8x64xf32>, vector<64x128xf32>, vector<8x128xf32> -> vector<8x128xf32>
    %c0_64 = arith.constant 0 : index
    %c0_65 = arith.constant 0 : index
    %261 = vector.load %arg6[%c0_64, %c0_65] : memref<1x128xf32, #tpu.memory_space<vmem>>, vector<1x128xf32>
    %262 = vector.broadcast %261 : vector<1x128xf32> to vector<8x128xf32>
    %263 = arith.addf %260, %262 : vector<8x128xf32>
    %c0_66 = arith.constant 0 : index
    %c0_67 = arith.constant 0 : index
    %264 = vector.load %arg16[%c0_66, %c0_67] : memref<8x128xf32, #tpu.memory_space<vmem>>, vector<8x128xf32>
    tpu.vector_store %arg16[%c0_66, %c0_67], %263 {strides = array<i32>} : memref<8x128xf32, #tpu.memory_space<vmem>>, vector<8x128xf32>,
    %c0_68 = arith.constant 0 : index
    %c0_69 = arith.constant 0 : index
    %265 = vector.load %arg5[%c0_68, %c0_69] : memref<32x128xf32, #tpu.memory_space<vmem>>, vector<32x128xf32>
    %cst_70 = arith.constant 0.000000e+00 : f32
    %266 = vector.broadcast %cst_70 : f32 to vector<1x32xf32>
    %cst_71 = arith.constant 0.000000e+00 : f32
    %267 = vector.broadcast %cst_71 : f32 to vector<1x32xf32>
    %c0_i32_72 = arith.constant 0 : i32
    %268 = arith.index_cast %c0_i32_72 : i32 to index
    %c0_73 = arith.constant 0 : index
    %269 = vector.load %arg16[%268, %c0_73] : memref<8x128xf32, #tpu.memory_space<vmem>>, vector<1x128xf32>
    %cst_74 = arith.constant dense<0.000000e+00> : vector<1x128xf32>
    %270 = tpu.matmul %266, %265, %cst_74 {dimension_numbers = #tpu.dot_dimension_numbers<[1], [0], [0], [1], [0, 0, 1, 1], [], []>} : vector<1x32xf32>, vector<32x128xf32>, vector<1x128xf32> -> vector<1x128xf32>
    %271 = arith.addf %269, %270 : vector<1x128xf32>
    %272 = vector.extract_strided_slice %271 {offsets = [0, 0], sizes = [1, 32], strides = [1, 1]} : vector<1x128xf32> to vector<1x32xf32>
    %273 = arith.negf %272 : vector<1x32xf32>
    %274 = math.exp %273 : vector<1x32xf32>
    %cst_75 = arith.constant 1.000000e+00 : f32
    %275 = vector.broadcast %cst_75 : f32 to vector<1x32xf32>
    %276 = arith.addf %275, %274 : vector<1x32xf32>
    %277 = arith.divf %275, %276 : vector<1x32xf32>
    %278 = vector.extract_strided_slice %271 {offsets = [0, 32], sizes = [1, 32], strides = [1, 1]} : vector<1x128xf32> to vector<1x32xf32>
    %279 = arith.negf %278 : vector<1x32xf32>
    %280 = math.exp %279 : vector<1x32xf32>
    %cst_76 = arith.constant 1.000000e+00 : f32
    %281 = vector.broadcast %cst_76 : f32 to vector<1x32xf32>
    %282 = arith.addf %281, %280 : vector<1x32xf32>
    %283 = arith.divf %281, %282 : vector<1x32xf32>
    %284 = vector.extract_strided_slice %271 {offsets = [0, 64], sizes = [1, 32], strides = [1, 1]} : vector<1x128xf32> to vector<1x32xf32>
    %285 = math.tanh %284 : vector<1x32xf32>
    %286 = vector.extract_strided_slice %271 {offsets = [0, 96], sizes = [1, 32], strides = [1, 1]} : vector<1x128xf32> to vector<1x32xf32>
    %287 = arith.negf %286 : vector<1x32xf32>
    %288 = math.exp %287 : vector<1x32xf32>
    %cst_77 = arith.constant 1.000000e+00 : f32
    %289 = vector.broadcast %cst_77 : f32 to vector<1x32xf32>
    %290 = arith.addf %289, %288 : vector<1x32xf32>
    %291 = arith.divf %289, %290 : vector<1x32xf32>
    %292 = arith.mulf %283, %267 : vector<1x32xf32>
    %293 = arith.mulf %277, %285 : vector<1x32xf32>
    %294 = arith.addf %292, %293 : vector<1x32xf32>
    %295 = math.tanh %294 : vector<1x32xf32>
    %296 = arith.mulf %291, %295 : vector<1x32xf32>
    %297 = arith.index_cast %c0_i32_72 : i32 to index
    %c0_78 = arith.constant 0 : index
    %298 = vector.load %arg17[%297, %c0_78] : memref<8x32xf32, #tpu.memory_space<vmem>>, vector<1x32xf32>
    tpu.vector_store %arg17[%297, %c0_78], %296 {strides = array<i32>} : memref<8x32xf32, #tpu.memory_space<vmem>>, vector<1x32xf32>,
    %c1_i32_79 = arith.constant 1 : i32
    %299 = arith.index_cast %c1_i32_79 : i32 to index
    %c0_80 = arith.constant 0 : index
    %300 = vector.load %arg16[%299, %c0_80] : memref<8x128xf32, #tpu.memory_space<vmem>>, vector<1x128xf32>
    %cst_81 = arith.constant dense<0.000000e+00> : vector<1x128xf32>
    %301 = tpu.matmul %296, %265, %cst_81 {dimension_numbers = #tpu.dot_dimension_numbers<[1], [0], [0], [1], [0, 0, 1, 1], [], []>} : vector<1x32xf32>, vector<32x128xf32>, vector<1x128xf32> -> vector<1x128xf32>
    %302 = arith.addf %300, %301 : vector<1x128xf32>
    %303 = vector.extract_strided_slice %302 {offsets = [0, 0], sizes = [1, 32], strides = [1, 1]} : vector<1x128xf32> to vector<1x32xf32>
    %304 = arith.negf %303 : vector<1x32xf32>
    %305 = math.exp %304 : vector<1x32xf32>
    %cst_82 = arith.constant 1.000000e+00 : f32
    %306 = vector.broadcast %cst_82 : f32 to vector<1x32xf32>
    %307 = arith.addf %306, %305 : vector<1x32xf32>
    %308 = arith.divf %306, %307 : vector<1x32xf32>
    %309 = vector.extract_strided_slice %302 {offsets = [0, 32], sizes = [1, 32], strides = [1, 1]} : vector<1x128xf32> to vector<1x32xf32>
    %310 = arith.negf %309 : vector<1x32xf32>
    %311 = math.exp %310 : vector<1x32xf32>
    %cst_83 = arith.constant 1.000000e+00 : f32
    %312 = vector.broadcast %cst_83 : f32 to vector<1x32xf32>
    %313 = arith.addf %312, %311 : vector<1x32xf32>
    %314 = arith.divf %312, %313 : vector<1x32xf32>
    %315 = vector.extract_strided_slice %302 {offsets = [0, 64], sizes = [1, 32], strides = [1, 1]} : vector<1x128xf32> to vector<1x32xf32>
    %316 = math.tanh %315 : vector<1x32xf32>
    %317 = vector.extract_strided_slice %302 {offsets = [0, 96], sizes = [1, 32], strides = [1, 1]} : vector<1x128xf32> to vector<1x32xf32>
    %318 = arith.negf %317 : vector<1x32xf32>
    %319 = math.exp %318 : vector<1x32xf32>
    %cst_84 = arith.constant 1.000000e+00 : f32
    %320 = vector.broadcast %cst_84 : f32 to vector<1x32xf32>
    %321 = arith.addf %320, %319 : vector<1x32xf32>
    %322 = arith.divf %320, %321 : vector<1x32xf32>
    %323 = arith.mulf %314, %294 : vector<1x32xf32>
    %324 = arith.mulf %308, %316 : vector<1x32xf32>
    %325 = arith.addf %323, %324 : vector<1x32xf32>
    %326 = math.tanh %325 : vector<1x32xf32>
    %327 = arith.mulf %322, %326 : vector<1x32xf32>
    %328 = arith.index_cast %c1_i32_79 : i32 to index
    %c0_85 = arith.constant 0 : index
    %329 = vector.load %arg17[%328, %c0_85] : memref<8x32xf32, #tpu.memory_space<vmem>>, vector<1x32xf32>
    tpu.vector_store %arg17[%328, %c0_85], %327 {strides = array<i32>} : memref<8x32xf32, #tpu.memory_space<vmem>>, vector<1x32xf32>,
    %c2_i32_86 = arith.constant 2 : i32
    %330 = arith.index_cast %c2_i32_86 : i32 to index
    %c0_87 = arith.constant 0 : index
    %331 = vector.load %arg16[%330, %c0_87] : memref<8x128xf32, #tpu.memory_space<vmem>>, vector<1x128xf32>
    %cst_88 = arith.constant dense<0.000000e+00> : vector<1x128xf32>
    %332 = tpu.matmul %327, %265, %cst_88 {dimension_numbers = #tpu.dot_dimension_numbers<[1], [0], [0], [1], [0, 0, 1, 1], [], []>} : vector<1x32xf32>, vector<32x128xf32>, vector<1x128xf32> -> vector<1x128xf32>
    %333 = arith.addf %331, %332 : vector<1x128xf32>
    %334 = vector.extract_strided_slice %333 {offsets = [0, 0], sizes = [1, 32], strides = [1, 1]} : vector<1x128xf32> to vector<1x32xf32>
    %335 = arith.negf %334 : vector<1x32xf32>
    %336 = math.exp %335 : vector<1x32xf32>
    %cst_89 = arith.constant 1.000000e+00 : f32
    %337 = vector.broadcast %cst_89 : f32 to vector<1x32xf32>
    %338 = arith.addf %337, %336 : vector<1x32xf32>
    %339 = arith.divf %337, %338 : vector<1x32xf32>
    %340 = vector.extract_strided_slice %333 {offsets = [0, 32], sizes = [1, 32], strides = [1, 1]} : vector<1x128xf32> to vector<1x32xf32>
    %341 = arith.negf %340 : vector<1x32xf32>
    %342 = math.exp %341 : vector<1x32xf32>
    %cst_90 = arith.constant 1.000000e+00 : f32
    %343 = vector.broadcast %cst_90 : f32 to vector<1x32xf32>
    %344 = arith.addf %343, %342 : vector<1x32xf32>
    %345 = arith.divf %343, %344 : vector<1x32xf32>
    %346 = vector.extract_strided_slice %333 {offsets = [0, 64], sizes = [1, 32], strides = [1, 1]} : vector<1x128xf32> to vector<1x32xf32>
    %347 = math.tanh %346 : vector<1x32xf32>
    %348 = vector.extract_strided_slice %333 {offsets = [0, 96], sizes = [1, 32], strides = [1, 1]} : vector<1x128xf32> to vector<1x32xf32>
    %349 = arith.negf %348 : vector<1x32xf32>
    %350 = math.exp %349 : vector<1x32xf32>
    %cst_91 = arith.constant 1.000000e+00 : f32
    %351 = vector.broadcast %cst_91 : f32 to vector<1x32xf32>
    %352 = arith.addf %351, %350 : vector<1x32xf32>
    %353 = arith.divf %351, %352 : vector<1x32xf32>
    %354 = arith.mulf %345, %325 : vector<1x32xf32>
    %355 = arith.mulf %339, %347 : vector<1x32xf32>
    %356 = arith.addf %354, %355 : vector<1x32xf32>
    %357 = math.tanh %356 : vector<1x32xf32>
    %358 = arith.mulf %353, %357 : vector<1x32xf32>
    %359 = arith.index_cast %c2_i32_86 : i32 to index
    %c0_92 = arith.constant 0 : index
    %360 = vector.load %arg17[%359, %c0_92] : memref<8x32xf32, #tpu.memory_space<vmem>>, vector<1x32xf32>
    tpu.vector_store %arg17[%359, %c0_92], %358 {strides = array<i32>} : memref<8x32xf32, #tpu.memory_space<vmem>>, vector<1x32xf32>,
    %c3_i32_93 = arith.constant 3 : i32
    %361 = arith.index_cast %c3_i32_93 : i32 to index
    %c0_94 = arith.constant 0 : index
    %362 = vector.load %arg16[%361, %c0_94] : memref<8x128xf32, #tpu.memory_space<vmem>>, vector<1x128xf32>
    %cst_95 = arith.constant dense<0.000000e+00> : vector<1x128xf32>
    %363 = tpu.matmul %358, %265, %cst_95 {dimension_numbers = #tpu.dot_dimension_numbers<[1], [0], [0], [1], [0, 0, 1, 1], [], []>} : vector<1x32xf32>, vector<32x128xf32>, vector<1x128xf32> -> vector<1x128xf32>
    %364 = arith.addf %362, %363 : vector<1x128xf32>
    %365 = vector.extract_strided_slice %364 {offsets = [0, 0], sizes = [1, 32], strides = [1, 1]} : vector<1x128xf32> to vector<1x32xf32>
    %366 = arith.negf %365 : vector<1x32xf32>
    %367 = math.exp %366 : vector<1x32xf32>
    %cst_96 = arith.constant 1.000000e+00 : f32
    %368 = vector.broadcast %cst_96 : f32 to vector<1x32xf32>
    %369 = arith.addf %368, %367 : vector<1x32xf32>
    %370 = arith.divf %368, %369 : vector<1x32xf32>
    %371 = vector.extract_strided_slice %364 {offsets = [0, 32], sizes = [1, 32], strides = [1, 1]} : vector<1x128xf32> to vector<1x32xf32>
    %372 = arith.negf %371 : vector<1x32xf32>
    %373 = math.exp %372 : vector<1x32xf32>
    %cst_97 = arith.constant 1.000000e+00 : f32
    %374 = vector.broadcast %cst_97 : f32 to vector<1x32xf32>
    %375 = arith.addf %374, %373 : vector<1x32xf32>
    %376 = arith.divf %374, %375 : vector<1x32xf32>
    %377 = vector.extract_strided_slice %364 {offsets = [0, 64], sizes = [1, 32], strides = [1, 1]} : vector<1x128xf32> to vector<1x32xf32>
    %378 = math.tanh %377 : vector<1x32xf32>
    %379 = vector.extract_strided_slice %364 {offsets = [0, 96], sizes = [1, 32], strides = [1, 1]} : vector<1x128xf32> to vector<1x32xf32>
    %380 = arith.negf %379 : vector<1x32xf32>
    %381 = math.exp %380 : vector<1x32xf32>
    %cst_98 = arith.constant 1.000000e+00 : f32
    %382 = vector.broadcast %cst_98 : f32 to vector<1x32xf32>
    %383 = arith.addf %382, %381 : vector<1x32xf32>
    %384 = arith.divf %382, %383 : vector<1x32xf32>
    %385 = arith.mulf %376, %356 : vector<1x32xf32>
    %386 = arith.mulf %370, %378 : vector<1x32xf32>
    %387 = arith.addf %385, %386 : vector<1x32xf32>
    %388 = math.tanh %387 : vector<1x32xf32>
    %389 = arith.mulf %384, %388 : vector<1x32xf32>
    %390 = arith.index_cast %c3_i32_93 : i32 to index
    %c0_99 = arith.constant 0 : index
    %391 = vector.load %arg17[%390, %c0_99] : memref<8x32xf32, #tpu.memory_space<vmem>>, vector<1x32xf32>
    tpu.vector_store %arg17[%390, %c0_99], %389 {strides = array<i32>} : memref<8x32xf32, #tpu.memory_space<vmem>>, vector<1x32xf32>,
    %c4_i32_100 = arith.constant 4 : i32
    %392 = arith.index_cast %c4_i32_100 : i32 to index
    %c0_101 = arith.constant 0 : index
    %393 = vector.load %arg16[%392, %c0_101] : memref<8x128xf32, #tpu.memory_space<vmem>>, vector<1x128xf32>
    %cst_102 = arith.constant dense<0.000000e+00> : vector<1x128xf32>
    %394 = tpu.matmul %389, %265, %cst_102 {dimension_numbers = #tpu.dot_dimension_numbers<[1], [0], [0], [1], [0, 0, 1, 1], [], []>} : vector<1x32xf32>, vector<32x128xf32>, vector<1x128xf32> -> vector<1x128xf32>
    %395 = arith.addf %393, %394 : vector<1x128xf32>
    %396 = vector.extract_strided_slice %395 {offsets = [0, 0], sizes = [1, 32], strides = [1, 1]} : vector<1x128xf32> to vector<1x32xf32>
    %397 = arith.negf %396 : vector<1x32xf32>
    %398 = math.exp %397 : vector<1x32xf32>
    %cst_103 = arith.constant 1.000000e+00 : f32
    %399 = vector.broadcast %cst_103 : f32 to vector<1x32xf32>
    %400 = arith.addf %399, %398 : vector<1x32xf32>
    %401 = arith.divf %399, %400 : vector<1x32xf32>
    %402 = vector.extract_strided_slice %395 {offsets = [0, 32], sizes = [1, 32], strides = [1, 1]} : vector<1x128xf32> to vector<1x32xf32>
    %403 = arith.negf %402 : vector<1x32xf32>
    %404 = math.exp %403 : vector<1x32xf32>
    %cst_104 = arith.constant 1.000000e+00 : f32
    %405 = vector.broadcast %cst_104 : f32 to vector<1x32xf32>
    %406 = arith.addf %405, %404 : vector<1x32xf32>
    %407 = arith.divf %405, %406 : vector<1x32xf32>
    %408 = vector.extract_strided_slice %395 {offsets = [0, 64], sizes = [1, 32], strides = [1, 1]} : vector<1x128xf32> to vector<1x32xf32>
    %409 = math.tanh %408 : vector<1x32xf32>
    %410 = vector.extract_strided_slice %395 {offsets = [0, 96], sizes = [1, 32], strides = [1, 1]} : vector<1x128xf32> to vector<1x32xf32>
    %411 = arith.negf %410 : vector<1x32xf32>
    %412 = math.exp %411 : vector<1x32xf32>
    %cst_105 = arith.constant 1.000000e+00 : f32
    %413 = vector.broadcast %cst_105 : f32 to vector<1x32xf32>
    %414 = arith.addf %413, %412 : vector<1x32xf32>
    %415 = arith.divf %413, %414 : vector<1x32xf32>
    %416 = arith.mulf %407, %387 : vector<1x32xf32>
    %417 = arith.mulf %401, %409 : vector<1x32xf32>
    %418 = arith.addf %416, %417 : vector<1x32xf32>
    %419 = math.tanh %418 : vector<1x32xf32>
    %420 = arith.mulf %415, %419 : vector<1x32xf32>
    %421 = arith.index_cast %c4_i32_100 : i32 to index
    %c0_106 = arith.constant 0 : index
    %422 = vector.load %arg17[%421, %c0_106] : memref<8x32xf32, #tpu.memory_space<vmem>>, vector<1x32xf32>
    tpu.vector_store %arg17[%421, %c0_106], %420 {strides = array<i32>} : memref<8x32xf32, #tpu.memory_space<vmem>>, vector<1x32xf32>,
    %c5_i32_107 = arith.constant 5 : i32
    %423 = arith.index_cast %c5_i32_107 : i32 to index
    %c0_108 = arith.constant 0 : index
    %424 = vector.load %arg16[%423, %c0_108] : memref<8x128xf32, #tpu.memory_space<vmem>>, vector<1x128xf32>
    %cst_109 = arith.constant dense<0.000000e+00> : vector<1x128xf32>
    %425 = tpu.matmul %420, %265, %cst_109 {dimension_numbers = #tpu.dot_dimension_numbers<[1], [0], [0], [1], [0, 0, 1, 1], [], []>} : vector<1x32xf32>, vector<32x128xf32>, vector<1x128xf32> -> vector<1x128xf32>
    %426 = arith.addf %424, %425 : vector<1x128xf32>
    %427 = vector.extract_strided_slice %426 {offsets = [0, 0], sizes = [1, 32], strides = [1, 1]} : vector<1x128xf32> to vector<1x32xf32>
    %428 = arith.negf %427 : vector<1x32xf32>
    %429 = math.exp %428 : vector<1x32xf32>
    %cst_110 = arith.constant 1.000000e+00 : f32
    %430 = vector.broadcast %cst_110 : f32 to vector<1x32xf32>
    %431 = arith.addf %430, %429 : vector<1x32xf32>
    %432 = arith.divf %430, %431 : vector<1x32xf32>
    %433 = vector.extract_strided_slice %426 {offsets = [0, 32], sizes = [1, 32], strides = [1, 1]} : vector<1x128xf32> to vector<1x32xf32>
    %434 = arith.negf %433 : vector<1x32xf32>
    %435 = math.exp %434 : vector<1x32xf32>
    %cst_111 = arith.constant 1.000000e+00 : f32
    %436 = vector.broadcast %cst_111 : f32 to vector<1x32xf32>
    %437 = arith.addf %436, %435 : vector<1x32xf32>
    %438 = arith.divf %436, %437 : vector<1x32xf32>
    %439 = vector.extract_strided_slice %426 {offsets = [0, 64], sizes = [1, 32], strides = [1, 1]} : vector<1x128xf32> to vector<1x32xf32>
    %440 = math.tanh %439 : vector<1x32xf32>
    %441 = vector.extract_strided_slice %426 {offsets = [0, 96], sizes = [1, 32], strides = [1, 1]} : vector<1x128xf32> to vector<1x32xf32>
    %442 = arith.negf %441 : vector<1x32xf32>
    %443 = math.exp %442 : vector<1x32xf32>
    %cst_112 = arith.constant 1.000000e+00 : f32
    %444 = vector.broadcast %cst_112 : f32 to vector<1x32xf32>
    %445 = arith.addf %444, %443 : vector<1x32xf32>
    %446 = arith.divf %444, %445 : vector<1x32xf32>
    %447 = arith.mulf %438, %418 : vector<1x32xf32>
    %448 = arith.mulf %432, %440 : vector<1x32xf32>
    %449 = arith.addf %447, %448 : vector<1x32xf32>
    %450 = math.tanh %449 : vector<1x32xf32>
    %451 = arith.mulf %446, %450 : vector<1x32xf32>
    %452 = arith.index_cast %c5_i32_107 : i32 to index
    %c0_113 = arith.constant 0 : index
    %453 = vector.load %arg17[%452, %c0_113] : memref<8x32xf32, #tpu.memory_space<vmem>>, vector<1x32xf32>
    tpu.vector_store %arg17[%452, %c0_113], %451 {strides = array<i32>} : memref<8x32xf32, #tpu.memory_space<vmem>>, vector<1x32xf32>,
    %c6_i32_114 = arith.constant 6 : i32
    %454 = arith.index_cast %c6_i32_114 : i32 to index
    %c0_115 = arith.constant 0 : index
    %455 = vector.load %arg16[%454, %c0_115] : memref<8x128xf32, #tpu.memory_space<vmem>>, vector<1x128xf32>
    %cst_116 = arith.constant dense<0.000000e+00> : vector<1x128xf32>
    %456 = tpu.matmul %451, %265, %cst_116 {dimension_numbers = #tpu.dot_dimension_numbers<[1], [0], [0], [1], [0, 0, 1, 1], [], []>} : vector<1x32xf32>, vector<32x128xf32>, vector<1x128xf32> -> vector<1x128xf32>
    %457 = arith.addf %455, %456 : vector<1x128xf32>
    %458 = vector.extract_strided_slice %457 {offsets = [0, 0], sizes = [1, 32], strides = [1, 1]} : vector<1x128xf32> to vector<1x32xf32>
    %459 = arith.negf %458 : vector<1x32xf32>
    %460 = math.exp %459 : vector<1x32xf32>
    %cst_117 = arith.constant 1.000000e+00 : f32
    %461 = vector.broadcast %cst_117 : f32 to vector<1x32xf32>
    %462 = arith.addf %461, %460 : vector<1x32xf32>
    %463 = arith.divf %461, %462 : vector<1x32xf32>
    %464 = vector.extract_strided_slice %457 {offsets = [0, 32], sizes = [1, 32], strides = [1, 1]} : vector<1x128xf32> to vector<1x32xf32>
    %465 = arith.negf %464 : vector<1x32xf32>
    %466 = math.exp %465 : vector<1x32xf32>
    %cst_118 = arith.constant 1.000000e+00 : f32
    %467 = vector.broadcast %cst_118 : f32 to vector<1x32xf32>
    %468 = arith.addf %467, %466 : vector<1x32xf32>
    %469 = arith.divf %467, %468 : vector<1x32xf32>
    %470 = vector.extract_strided_slice %457 {offsets = [0, 64], sizes = [1, 32], strides = [1, 1]} : vector<1x128xf32> to vector<1x32xf32>
    %471 = math.tanh %470 : vector<1x32xf32>
    %472 = vector.extract_strided_slice %457 {offsets = [0, 96], sizes = [1, 32], strides = [1, 1]} : vector<1x128xf32> to vector<1x32xf32>
    %473 = arith.negf %472 : vector<1x32xf32>
    %474 = math.exp %473 : vector<1x32xf32>
    %cst_119 = arith.constant 1.000000e+00 : f32
    %475 = vector.broadcast %cst_119 : f32 to vector<1x32xf32>
    %476 = arith.addf %475, %474 : vector<1x32xf32>
    %477 = arith.divf %475, %476 : vector<1x32xf32>
    %478 = arith.mulf %469, %449 : vector<1x32xf32>
    %479 = arith.mulf %463, %471 : vector<1x32xf32>
    %480 = arith.addf %478, %479 : vector<1x32xf32>
    %481 = math.tanh %480 : vector<1x32xf32>
    %482 = arith.mulf %477, %481 : vector<1x32xf32>
    %483 = arith.index_cast %c6_i32_114 : i32 to index
    %c0_120 = arith.constant 0 : index
    %484 = vector.load %arg17[%483, %c0_120] : memref<8x32xf32, #tpu.memory_space<vmem>>, vector<1x32xf32>
    tpu.vector_store %arg17[%483, %c0_120], %482 {strides = array<i32>} : memref<8x32xf32, #tpu.memory_space<vmem>>, vector<1x32xf32>,
    %c7_i32_121 = arith.constant 7 : i32
    %485 = arith.index_cast %c7_i32_121 : i32 to index
    %c0_122 = arith.constant 0 : index
    %486 = vector.load %arg16[%485, %c0_122] : memref<8x128xf32, #tpu.memory_space<vmem>>, vector<1x128xf32>
    %cst_123 = arith.constant dense<0.000000e+00> : vector<1x128xf32>
    %487 = tpu.matmul %482, %265, %cst_123 {dimension_numbers = #tpu.dot_dimension_numbers<[1], [0], [0], [1], [0, 0, 1, 1], [], []>} : vector<1x32xf32>, vector<32x128xf32>, vector<1x128xf32> -> vector<1x128xf32>
    %488 = arith.addf %486, %487 : vector<1x128xf32>
    %489 = vector.extract_strided_slice %488 {offsets = [0, 0], sizes = [1, 32], strides = [1, 1]} : vector<1x128xf32> to vector<1x32xf32>
    %490 = arith.negf %489 : vector<1x32xf32>
    %491 = math.exp %490 : vector<1x32xf32>
    %cst_124 = arith.constant 1.000000e+00 : f32
    %492 = vector.broadcast %cst_124 : f32 to vector<1x32xf32>
    %493 = arith.addf %492, %491 : vector<1x32xf32>
    %494 = arith.divf %492, %493 : vector<1x32xf32>
    %495 = vector.extract_strided_slice %488 {offsets = [0, 32], sizes = [1, 32], strides = [1, 1]} : vector<1x128xf32> to vector<1x32xf32>
    %496 = arith.negf %495 : vector<1x32xf32>
    %497 = math.exp %496 : vector<1x32xf32>
    %cst_125 = arith.constant 1.000000e+00 : f32
    %498 = vector.broadcast %cst_125 : f32 to vector<1x32xf32>
    %499 = arith.addf %498, %497 : vector<1x32xf32>
    %500 = arith.divf %498, %499 : vector<1x32xf32>
    %501 = vector.extract_strided_slice %488 {offsets = [0, 64], sizes = [1, 32], strides = [1, 1]} : vector<1x128xf32> to vector<1x32xf32>
    %502 = math.tanh %501 : vector<1x32xf32>
    %503 = vector.extract_strided_slice %488 {offsets = [0, 96], sizes = [1, 32], strides = [1, 1]} : vector<1x128xf32> to vector<1x32xf32>
    %504 = arith.negf %503 : vector<1x32xf32>
    %505 = math.exp %504 : vector<1x32xf32>
    %cst_126 = arith.constant 1.000000e+00 : f32
    %506 = vector.broadcast %cst_126 : f32 to vector<1x32xf32>
    %507 = arith.addf %506, %505 : vector<1x32xf32>
    %508 = arith.divf %506, %507 : vector<1x32xf32>
    %509 = arith.mulf %500, %480 : vector<1x32xf32>
    %510 = arith.mulf %494, %502 : vector<1x32xf32>
    %511 = arith.addf %509, %510 : vector<1x32xf32>
    %512 = math.tanh %511 : vector<1x32xf32>
    %513 = arith.mulf %508, %512 : vector<1x32xf32>
    %514 = arith.index_cast %c7_i32_121 : i32 to index
    %c0_127 = arith.constant 0 : index
    %515 = vector.load %arg17[%514, %c0_127] : memref<8x32xf32, #tpu.memory_space<vmem>>, vector<1x32xf32>
    tpu.vector_store %arg17[%514, %c0_127], %513 {strides = array<i32>} : memref<8x32xf32, #tpu.memory_space<vmem>>, vector<1x32xf32>,
    %c8_i32_128 = arith.constant 8 : i32
    %c0_129 = arith.constant 0 : index
    %c0_130 = arith.constant 0 : index
    %516 = vector.load %arg17[%c0_129, %c0_130] : memref<8x32xf32, #tpu.memory_space<vmem>>, vector<8x32xf32>
    %c0_131 = arith.constant 0 : index
    %c0_132 = arith.constant 0 : index
    %517 = vector.load %arg7[%c0_131, %c0_132] : memref<32x32xf32, #tpu.memory_space<vmem>>, vector<32x32xf32>
    %cst_133 = arith.constant dense<0.000000e+00> : vector<8x32xf32>
    %518 = tpu.matmul %516, %517, %cst_133 {dimension_numbers = #tpu.dot_dimension_numbers<[1], [0], [0], [1], [0, 0, 1, 1], [], []>} : vector<8x32xf32>, vector<32x32xf32>, vector<8x32xf32> -> vector<8x32xf32>
    %c0_134 = arith.constant 0 : index
    %c0_135 = arith.constant 0 : index
    %519 = vector.load %arg8[%c0_134, %c0_135] : memref<1x32xf32, #tpu.memory_space<vmem>>, vector<1x32xf32>
    %520 = vector.broadcast %519 : vector<1x32xf32> to vector<8x32xf32>
    %521 = arith.addf %518, %520 : vector<8x32xf32>
    %cst_136 = arith.constant 0.000000e+00 : f32
    %522 = vector.broadcast %cst_136 : f32 to vector<8x32xf32>
    %523 = arith.maximumf %521, %522 : vector<8x32xf32>
    %c0_137 = arith.constant 0 : index
    %c0_138 = arith.constant 0 : index
    %524 = vector.load %arg9[%c0_137, %c0_138] : memref<32x16xf32, #tpu.memory_space<vmem>>, vector<32x16xf32>
    %cst_139 = arith.constant dense<0.000000e+00> : vector<8x16xf32>
    %525 = tpu.matmul %523, %524, %cst_139 {dimension_numbers = #tpu.dot_dimension_numbers<[1], [0], [0], [1], [0, 0, 1, 1], [], []>} : vector<8x32xf32>, vector<32x16xf32>, vector<8x16xf32> -> vector<8x16xf32>
    %c0_140 = arith.constant 0 : index
    %c0_141 = arith.constant 0 : index
    %526 = vector.load %arg10[%c0_140, %c0_141] : memref<1x16xf32, #tpu.memory_space<vmem>>, vector<1x16xf32>
    %527 = vector.broadcast %526 : vector<1x16xf32> to vector<8x16xf32>
    %528 = arith.addf %525, %527 : vector<8x16xf32>
    %cst_142 = arith.constant 0.000000e+00 : f32
    %529 = vector.broadcast %cst_142 : f32 to vector<8x16xf32>
    %530 = arith.maximumf %528, %529 : vector<8x16xf32>
    %c0_143 = arith.constant 0 : index
    %c0_144 = arith.constant 0 : index
    %531 = vector.load %arg11[%c0_143, %c0_144] : memref<16x1xf32, #tpu.memory_space<vmem>>, vector<16x1xf32>
    %cst_145 = arith.constant dense<0.000000e+00> : vector<8x1xf32>
    %532 = tpu.matmul %530, %531, %cst_145 {dimension_numbers = #tpu.dot_dimension_numbers<[1], [0], [0], [1], [0, 0, 1, 1], [], []>} : vector<8x16xf32>, vector<16x1xf32>, vector<8x1xf32> -> vector<8x1xf32>
    %c0_146 = arith.constant 0 : index
    %c0_147 = arith.constant 0 : index
    %533 = vector.load %arg12[%c0_146, %c0_147] : memref<1x1xf32, #tpu.memory_space<vmem>>, vector<1x1xf32>
    %534 = vector.broadcast %533 : vector<1x1xf32> to vector<8x1xf32>
    %535 = arith.addf %532, %534 : vector<8x1xf32>
    %c0_148 = arith.constant 0 : index
    %c0_149 = arith.constant 0 : index
    %536 = vector.load %arg13[%c0_148, %c0_149] : memref<8x1xf32, #tpu.memory_space<vmem>>, vector<8x1xf32>
    tpu.vector_store %arg13[%c0_148, %c0_149], %535 {strides = array<i32>} : memref<8x1xf32, #tpu.memory_space<vmem>>, vector<8x1xf32>,
    return
  }
}

</mosaic_0001>

<bundles_post_ra>
// kernel: temporal_lstm_combined_channels.1
= control target key start
LH: loop header
LB: loop body
LE: loop exit
PB: predicated region body
PF: predicated region fallthrough
CT: control target
= control target key end

     0   :  { %s3599_s0 = inlined_call_operand.vmem [shape: f32[8,64], index: 0, kind: input, shape index: {}]   ;;  %s3600_s1 = inlined_call_operand.hbm [shape: f32[64,256], index: 1, kind: input, shape index: {}]   ;;  %s3601_s2 = inlined_call_operand.hbm [shape: f32[64,256], index: 2, kind: input, shape index: {}]   ;;  %s3602_s3 = inlined_call_operand.vmem [shape: f32[1,256], index: 3, kind: input, shape index: {}]   ;;  %s3603_s4 = inlined_call_operand.vmem [shape: f32[64,128], index: 4, kind: input, shape index: {}]   ;;  %s3604_s5 = inlined_call_operand.vmem [shape: f32[32,128], index: 5, kind: input, shape index: {}]   ;;  %s3605_s6 = inlined_call_operand.vmem [shape: f32[1,128], index: 6, kind: input, shape index: {}]   ;;  %s3606_s7 = inlined_call_operand.hbm [shape: f32[32,32], index: 7, kind: input, shape index: {}]   ;;  %s3607_s8 = inlined_call_operand.vmem [shape: f32[1,32], index: 8, kind: input, shape index: {}]   ;;  %s3608_s9 = inlined_call_operand.vmem [shape: f32[32,16], index: 9, kind: input, shape index: {}]   ;;  %s3609_s10 = inlined_call_operand.vmem [shape: f32[1,16], index: 10, kind: input, shape index: {}]   ;;  %s3610_s11 = inlined_call_operand.vmem [shape: f32[16,1], index: 11, kind: input, shape index: {}]   ;;  %s3611_s12 = inlined_call_operand.<no memory space> [shape: f32[1,1], index: 12, kind: input, shape index: {}]   ;;  %s3612_s13 = inlined_call_operand.vmem [shape: f32[8,1], index: 13, kind: output, shape index: {}]  }
   0x1   :  { %v18_v0 = vstv %s3611_s12 }
   0x2   :  { %19 = vst [vmem:[#allocation6] sm:$0x1] %v18_v0 }
   0x3   :  { %20 = vsyncpa [#allocation8], 0 }
   0x4   :  { %21 = vsyncpa [#allocation10], 0  ;;  %s3130_s27 = smov [#allocation9]   ;;  %s3131_s29 = smov [#allocation7]  }
   0x5   :  { %s41_s28 = sshll.u32 %s3130_s27, 4  ;;  %s29_s30 = sshll.u32 %s3131_s29, 4  ;;  %s42_s28 = int_to_ptr.vmem [resolvable:$true] %s41_s28  ;;  %s3216_s30 = int_to_ptr.vmem [resolvable:$true] %s29_s30 }
   0x6   :  { %s3060_s16 = scalar_lea.hbm %s3601_s2, 2048 }
   0x7   :  { %p3061_p0 = scmp.ne.s32.totalorder %s3601_s2, %s3060_s16  ;;  %p3064_p1 = scmp.lt.u32.totalorder %s3060_s16, %s3601_s2 }
   0x9   :  { %p3066_p2 = pnand %p3064_p1, %p3061_p0 }
   0xb   :  { %3069 = shalt.err (!%p3066_p2)
}
   0xc   :  { %s3070_s20 = scalar_lea.vmem %s42_s28, 2048  ;;  %p3075_p4 = scmp.lt.s32.totalorder %s42_s28, %s42_s28 }
   0xd   :  { %p3071_p3 = scmp.ne.s32.totalorder %s42_s28, %s3070_s20  ;;  %p3076_p5 = scmp.lt.s32.totalorder %s3070_s20, %s3070_s20 }
   0xf   :  { %p3077_p6 = por %p3076_p5, %p3075_p4 }
  0x11   :  { %p3078_p7 = pnand %p3077_p6, %p3071_p3 }
  0x13   :  { %3081 = shalt.err (!%p3078_p7)
}
  0x14   :  { %s3132_s21 = smov 256   ;;  %s3133_s22 = smov 16  }
  0x15   :  { %47 = dma.hbm_to_vmem [thread:$0]  %s3601_s2, 2048, %s42_s28, [#allocation10], %s3132_s21, %s3132_s21, %s3133_s22  }
  0x16   :  { %s3082_s27 = scalar_lea.hbm %s3600_s1, 2048 }
  0x17   :  { %p3083_p8 = scmp.ne.s32.totalorder %s3600_s1, %s3082_s27  ;;  %p3086_p9 = scmp.lt.u32.totalorder %s3082_s27, %s3600_s1 }
  0x19   :  { %p3088_p10 = pnand %p3086_p9, %p3083_p8 }
  0x1b   :  { %3091 = shalt.err (!%p3088_p10)
}
  0x1c   :  { %s3092_s17 = scalar_lea.vmem %s3216_s30, 2048  ;;  %p3097_p12 = scmp.lt.s32.totalorder %s3216_s30, %s3216_s30 }
  0x1d   :  { %p3093_p11 = scmp.ne.s32.totalorder %s3216_s30, %s3092_s17  ;;  %p3098_p13 = scmp.lt.s32.totalorder %s3092_s17, %s3092_s17 }
  0x1f   :  { %p3099_p0 = por %p3098_p13, %p3097_p12 }
  0x21   :  { %p3100_p1 = pnand %p3099_p0, %p3093_p11 }
  0x23   :  { %3103 = shalt.err (!%p3100_p1)
}
  0x24   :  { %35 = dma.hbm_to_vmem [thread:$0]  %s3600_s1, 2048, %s3216_s30, [#allocation8], %s3132_s21, %s3132_s21, %s3133_s22  }
  0x25   :  { %s3134_s18 = smov [#allocation11]   ;;  %s3104_s23 = scalar_lea.hbm %s3606_s7, 512 }
  0x26   :  { %s61_s19 = sshll.u32 %s3134_s18, 4  ;;  %p3105_p2 = scmp.ne.s32.totalorder %s3606_s7, %s3104_s23  ;;  %s62_s19 = int_to_ptr.vmem [resolvable:$true] %s61_s19 }
  0x27   :  { %p3108_p3 = scmp.lt.u32.totalorder %s3104_s23, %s3606_s7 }
  0x29   :  { %p3110_p4 = pnand %p3108_p3, %p3105_p2 }
  0x2b   :  { %3113 = shalt.err (!%p3110_p4)
}
  0x2c   :  { %s3114_s29 = scalar_lea.vmem %s62_s19, 512  ;;  %p3119_p6 = scmp.lt.s32.totalorder %s62_s19, %s62_s19 }
  0x2d   :  { %p3115_p5 = scmp.ne.s32.totalorder %s62_s19, %s3114_s29  ;;  %p3120_p7 = scmp.lt.s32.totalorder %s3114_s29, %s3114_s29 }
  0x2f   :  { %p3121_p8 = por %p3120_p7, %p3119_p6 }
  0x31   :  { %p3122_p9 = pnand %p3121_p8, %p3115_p5 }
  0x33   :  { %3125 = shalt.err (!%p3122_p9)
}
  0x34   :  { %s3135_s1 = smov 128   ;;  %s3136_s30 = smov 8  }
  0x35   :  { %67 = dma.hbm_to_vmem [thread:$0]  %s3606_s7, 512, %s62_s19, [#allocation10], %s3135_s1, %s3135_s1, %s3136_s30  }
  0x36   :  { %3126 = dma.done.wait [#allocation8], 2048  }
  0x37   :  { %3127 = vsyncadd [#allocation8], 4294965248 }
  0x38   :  { %3128 = dma.done.wait [#allocation10], 2560  }
  0x39   :  { %3129 = vsyncadd [#allocation10], 4294964736  ;;  %v3137_v1 = vmov 0.0   ;;  %v89_v2 = vld [vmem:[#allocation7 + $0x8] sm:$0xff]  ;;  %v91_v3 = vld [vmem:[#allocation7 + $0x18] sm:$0xff]  ;;  %vm116_vm0 = vcmask 523264   ;;  %v106_v51 = vlaneseq }
  0x3a   :  { %184 = vmatprep.mubr.f32.mxu0 %v3137_v1  ;;  %277 = vmatprep.mubr.f32.mxu1 %v3137_v1  ;;  %v88_v4 = vld [vmem:[#allocation7] sm:$0xff]  ;;  %v2668_v5 = vpack.c.bf16 %v91_v3, %v89_v2  ;;  %v90_v6 = vld [vmem:[#allocation7 + $0x10] sm:$0xff]  ;;  %v194_v7 = vld [vmem:[#allocation9 + $0x8] sm:$0xff]  ;;  %v3138_v55 = vmov 1966171168   ;;  %vm336_vm1 = vcmask 516096  }
  0x3b   :  { %v196_v8 = vld [vmem:[#allocation9 + $0x18] sm:$0xff]  ;;  %v2670_v9 = vpack.c.bf16 %v90_v6, %v88_v4  ;;  %v93_v11 = vld [vmem:[#allocation7 + $0x28] sm:$0xff]  ;;  %v193_v13 = vld [vmem:[#allocation9] sm:$0xff]  ;;  %v107_v52 = vshrl.u32 %v106_v51, 7  ;;  %v288_v56 = vunpack.c.l.s4 %v3138_v55  ;;  %vm3141_vm2 = vmmov 0   ;;  %s3142_s2 = smov 32  }
  0x3c   :  { %v3261_v10 = vpack.c.bf16 %v196_v8, %v194_v7  ;;  %v95_v12 = vld [vmem:[#allocation7 + $0x38] sm:$0xff]  ;;  %2669 = vmatprep.subr.bf16.mxu0 %v2668_v5  ;;  %v195_v15 = vld [vmem:[#allocation9 + $0x10] sm:$0xff]  ;;  %v92_v16 = vld [vmem:[#allocation7 + $0x20] sm:$0xff]  ;;  %vm1438_vm3 = vcmask 253952   ;;  %vm1336_vm4 = vcmask 261120   ;;  %vm2341_vm5 = vcmask 130048  }
  0x3d   :  { %v2672_v14 = vpack.c.bf16 %v95_v12, %v93_v11  ;;  %v94_v17 = vld [vmem:[#allocation7 + $0x30] sm:$0xff]  ;;  %2671 = vmatpush1.bf16.msra.mxu0 %v2670_v9  ;;  %v3264_v18 = vpack.c.bf16 %v195_v15, %v193_v13  ;;  %v198_v20 = vld [vmem:[#allocation9 + $0x28] sm:$0xff]  ;;  %v200_v21 = vld [vmem:[#allocation9 + $0x38] sm:$0xff]  ;;  %v108_v53 = vsub.s32 0, %v107_v52  ;;  %v112_v57 = vsub.s32 1, %v107_v52 }
  0x3e   :  { %2685 = vmatprep.subr.bf16.mxu1 %v3261_v10  ;;  %v2674_v19 = vpack.c.bf16 %v94_v17, %v92_v16  ;;  %v97_v22 = vld [vmem:[#allocation7 + $0x48] sm:$0xff]  ;;  %v3266_v23 = vpack.c.bf16 %v200_v21, %v198_v20  ;;  %v99_v24 = vld [vmem:[#allocation7 + $0x58] sm:$0xff]  ;;  %v197_v25 = vld [vmem:[#allocation9 + $0x20] sm:$0xff]  ;;  %v289_v59 = vunpack.c.0.s8 %v288_v56  ;;  %vm2415_vm6 = vcmask 7168  }
  0x3f   :  { %2673 = vmatprep.subr.bf16.mxu0 %v2672_v14  ;;  %v199_v26 = vld [vmem:[#allocation9 + $0x30] sm:$0xff]  ;;  %2687 = vmatpush1.bf16.msra.mxu1 %v3264_v18  ;;  %v2676_v27 = vpack.c.bf16 %v99_v24, %v97_v22  ;;  %v96_v29 = vld [vmem:[#allocation7 + $0x40] sm:$0xff]  ;;  %v202_v31 = vld [vmem:[#allocation9 + $0x48] sm:$0xff] }
  0x40   :  { %v3269_v28 = vpack.c.bf16 %v199_v26, %v197_v25  ;;  %v98_v30 = vld [vmem:[#allocation7 + $0x50] sm:$0xff]  ;;  %2689 = vmatprep.subr.bf16.mxu1 %v3266_v23  ;;  %v204_v32 = vld [vmem:[#allocation9 + $0x58] sm:$0xff]  ;;  %v101_v33 = vld [vmem:[#allocation7 + $0x68] sm:$0xff]  ;;  %v3313_v0 = vsub.s32 %v289_v59, %v107_v52 }
  0x41   :  { %v103_v34 = vld [vmem:[#allocation7 + $0x78] sm:$0xff]  ;;  %2675 = vmatpush1.bf16.msra.mxu0 %v2674_v19  ;;  %v2678_v35 = vpack.c.bf16 %v98_v30, %v96_v29  ;;  %v3272_v36 = vpack.c.bf16 %v204_v32, %v202_v31  ;;  %v201_v37 = vld [vmem:[#allocation9 + $0x40] sm:$0xff]  ;;  %v203_v38 = vld [vmem:[#allocation9 + $0x50] sm:$0xff] }
  0x42   :  { %v100_v39 = vld [vmem:[#allocation7 + $0x60] sm:$0xff]  ;;  %2677 = vmatprep.subr.bf16.mxu0 %v2676_v27  ;;  %v2680_v40 = vpack.c.bf16 %v103_v34, %v101_v33  ;;  %v102_v41 = vld [vmem:[#allocation7 + $0x70] sm:$0xff]  ;;  %v206_v42 = vld [vmem:[#allocation9 + $0x68] sm:$0xff]  ;;  %v3275_v44 = vpack.c.bf16 %v203_v38, %v201_v37 }
  0x43   :  { %v208_v43 = vld [vmem:[#allocation9 + $0x78] sm:$0xff]  ;;  %2691 = vmatpush1.bf16.msra.mxu1 %v3269_v28  ;;  %v205_v46 = vld [vmem:[#allocation9 + $0x60] sm:$0xff]  ;;  %v207_v47 = vld [vmem:[#allocation9 + $0x70] sm:$0xff]  ;;  %v2682_v48 = vpack.c.bf16 %v102_v41, %v100_v39 }
  0x44   :  { %2693 = vmatprep.subr.bf16.mxu1 %v3272_v36  ;;  %v3278_v45 = vpack.c.bf16 %v208_v43, %v206_v42  ;;  %v3281_v49 = vpack.c.bf16 %v207_v47, %v205_v46  ;;  %v87_v50 = vld [vmem:[%s3599_s0] sm:$0xff] }
  0x45   :  { %2679 = vmatpush1.bf16.msra.mxu0 %v2678_v35  ;;  %v104_v54 = vld [vmem:[%s3602_s3] sm:$0x3]  ;;  %s3139_s3 = smov 64  }
  0x46   :  { %2681 = vmatprep.subr.bf16.mxu0 %v2680_v40  ;;  %v109_v58 = vrot.slane %v104_v54, %v108_v53  ;;  %v113_v60 = vrot.slane %v104_v54, %v112_v57 }
  0x47   :  { %2695 = vmatpush1.bf16.msra.mxu1 %v3275_v44 }
  0x48   :  { %2697 = vmatprep.subr.bf16.mxu1 %v3278_v45 }
  0x49   :  { %2683 = vmatpush1.bf16.msra.mxu0 %v2682_v48 }
  0x4a   :  { %2701 = vmatprep.subr.bf16.mxu0 %v3261_v10 }
  0x4b   :  { %2699 = vmatpush1.bf16.msra.mxu1 %v3281_v49 }
  0x4c   :  { %2423 = vmatmul.mubr.msk.f32.vlgmr.msra.gmra.mrb[0].mxu0 %vm116_vm0, %v87_v50  ;;  %2717 = vmatprep.subr.bf16.mxu1 %v3261_v10 }
  0x4d   :  { %2703 = vmatpush1.bf16.msra.mxu0 %v3264_v18  ;;  %407 = vmatprep.mubr.f32.mxu0 %v3137_v1 }
  0x4e   :  { %278 = vmatmul.mubr.f32.vlgmr.msra.gmra.mrb[0].mxu1 %v3137_v1  ;;  %2705 = vmatprep.subr.bf16.mxu0 %v3266_v23 }
  0x4f   :  { %2719 = vmatpush1.bf16.msra.mxu1 %v3264_v18  ;;  %536 = vmatprep.mubr.f32.mxu1 %v3137_v1 }
  0x50   :  { %2721 = vmatprep.subr.bf16.mxu1 %v3266_v23 }
  0x51   :  { %2707 = vmatpush1.bf16.msra.mxu0 %v3269_v28 }
  0x52   :  { %2709 = vmatprep.subr.bf16.mxu0 %v3272_v36 }
  0x53   :  { %2723 = vmatpush1.bf16.msra.mxu1 %v3269_v28 }
  0x54   :  { %2725 = vmatprep.subr.bf16.mxu1 %v3272_v36 }
  0x55   :  { %2711 = vmatpush1.bf16.msra.mxu0 %v3275_v44 }
  0x56   :  { %2713 = vmatprep.subr.bf16.mxu0 %v3278_v45 }
  0x57   :  { %2727 = vmatpush1.bf16.msra.mxu1 %v3275_v44 }
  0x58   :  { %2729 = vmatprep.subr.bf16.mxu1 %v3278_v45 }
  0x59   :  { %2715 = vmatpush1.bf16.msra.mxu0 %v3281_v49 }
  0x5a   :  { %2733 = vmatprep.subr.bf16.mxu0 %v3261_v10 }
  0x5b   :  { %2731 = vmatpush1.bf16.msra.mxu1 %v3281_v49 }
  0x5c   :  { %2749 = vmatprep.subr.bf16.mxu1 %v3261_v10 }
 0x11f   :  { %v186_v61 = vpop.f32.mrb[0].mxu0 }
 0x120   :  { %v187_v62 = vadd.f32 %v186_v61, %v109_v58  ;;  %v188_v63 = vpop.f32.mrb[1].mxu0 }
 0x121   :  { %v189_v2 = vadd.f32 %v188_v63, %v113_v60  ;;  %v279_v3 = vpop.f32.mrb[0].mxu1 }
 0x122   :  { %191 = vst [vmem:[#allocation2] sm:$0xff] %v187_v62  ;;  %v281_v4 = vpop.f32.mrb[1].mxu1 }
 0x123   :  { %192 = vst [vmem:[#allocation2 + $0x8] sm:$0xff] %v189_v2  ;;  %v286_v5 = vcombine.low %v279_v3, %v281_v4 }
 0x125   :  { %v293_v6 = vrot.slane %v286_v5, %v3313_v0 }
 0x127   :  { %v300_v7 = vrot.slane %v293_v6, %v3313_v0 }
 0x12a   :  { %v209_v8 = vld [vmem:[#allocation2] ss:$8 sm:$0x3]  ;;  %v339_v39 = vld [vmem:[#allocation2 + $0x1] ss:$8 sm:$0x3] }
 0x12b   :  { %v302_v9 = vadd.f32 %v300_v7, %v209_v8  ;;  %v468_v6 = vld [vmem:[#allocation2 + $0x2] ss:$8 sm:$0x3] }
 0x12d   :  { %v2424_v11 = vmul.f32 -1.442695, %v302_v9  ;;  %v310_v12 = vrot.slane %v302_v9, 1 }
 0x12f   :  { %2900 = vpow2.f32 %v2424_v11 }
 0x130   :  { %2902 = vtanh.f32 %v310_v12 }
 0x139   :  { %v2901_v13 = vpop.eup %2900 }
 0x13a   :  { %v306_v14 = vadd.f32 1.0, %v2901_v13  ;;  %v2903_v15 = vpop.eup %2902 }
 0x13c   :  { %2904 = vrcp.f32 %v306_v14 }
 0x146   :  { %v2905_v16 = vpop.eup %2904 }
 0x147   :  { %v324_v17 = vmul.f32 %v2905_v16, %v2903_v15  ;;  %v323_v19 = vmul.f32 0.0, %v2905_v16 }
 0x149   :  { %326 = vrot.lane.b32.xlu0 %v324_v17, %s3139_s3 }
 0x14d   :  { %313 = vrot.lane.b32.xlu0 %v302_v9, %s3139_s3 }
 0x1bb   :  { %v327_v20 = vpop.permute.xlu0 %326 }
 0x1bc   :  { %v329_v21 = vadd.f32 %v327_v20, %v323_v19 }
 0x1be   :  { %2906 = vtanh.f32 %v329_v21 }
 0x1bf   :  { %v314_v24 = vpop.permute.xlu0 %313 }
 0x1c0   :  { %v315_v25 = vrot.slane %v314_v24, 1 }
 0x1c2   :  { %v2425_v26 = vmul.f32 -1.442695, %v315_v25 }
 0x1c4   :  { %2908 = vpow2.f32 %v2425_v26 }
 0x1c8   :  { %v2907_v22 = vpop.eup %2906 }
 0x1c9   :  { %332 = vrot.lane.b32.xlu1 %v2907_v22, %s3139_s3 }
 0x1ce   :  { %v2909_v27 = vpop.eup %2908 }
 0x1cf   :  { %v320_v29 = vadd.f32 1.0, %v2909_v27 }
 0x1d1   :  { %2910 = vrcp.f32 %v320_v29 }
 0x1db   :  { %v2911_v30 = vpop.eup %2910 }
 0x23b   :  { %v333_v31 = vpop.permute.xlu1 %332 }
 0x23c   :  { %v335_v32 = vmul.f32 %v2911_v30, %v333_v31 }
 0x23e   :  { %337 = vst.msk [vmem:[#allocation3] sm:$0x1] %vm336_vm1, %v335_v32  ;;  %2426 = vmatmul.mubr.msk.f32.vlgmr.msra.gmra.mrb[2].mxu0 %vm116_vm0, %v335_v32 }
 0x23f   :  { %2735 = vmatpush1.bf16.msra.mxu0 %v3264_v18  ;;  %665 = vmatprep.mubr.f32.mxu0 %v3137_v1 }
 0x240   :  { %2737 = vmatprep.subr.bf16.mxu0 %v3266_v23 }
 0x243   :  { %2739 = vmatpush1.bf16.msra.mxu0 %v3269_v28 }
 0x244   :  { %2741 = vmatprep.subr.bf16.mxu0 %v3272_v36 }
 0x247   :  { %2743 = vmatpush1.bf16.msra.mxu0 %v3275_v44 }
 0x248   :  { %2745 = vmatprep.subr.bf16.mxu0 %v3278_v45 }
 0x24b   :  { %2747 = vmatpush1.bf16.msra.mxu0 %v3281_v49 }
 0x24c   :  { %2765 = vmatprep.subr.bf16.mxu0 %v3261_v10 }
 0x311   :  { %v409_v33 = vpop.f32.mrb[2].mxu0 }
 0x312   :  { %v411_v34 = vpop.f32.mrb[3].mxu0 }
 0x313   :  { %v416_v35 = vcombine.low %v409_v33, %v411_v34 }
 0x315   :  { %v423_v37 = vrot.slane %v416_v35, %v3313_v0 }
 0x317   :  { %v430_v38 = vrot.slane %v423_v37, %v3313_v0  ;;  %v597_v37 = vld [vmem:[#allocation2 + $0x3] ss:$8 sm:$0x3] }
 0x319   :  { %v432_v40 = vadd.f32 %v430_v38, %v339_v39 }
 0x31b   :  { %443 = vrot.lane.b32.xlu0 %v432_v40, %s3139_s3  ;;  %v2427_v41 = vmul.f32 -1.442695, %v432_v40  ;;  %v440_v42 = vrot.slane %v432_v40, 1 }
 0x31d   :  { %2912 = vpow2.f32 %v2427_v41 }
 0x31e   :  { %2914 = vtanh.f32 %v440_v42 }
 0x327   :  { %v2913_v43 = vpop.eup %2912 }
 0x328   :  { %v436_v46 = vadd.f32 1.0, %v2913_v43  ;;  %v2915_v47 = vpop.eup %2914 }
 0x32a   :  { %2916 = vrcp.f32 %v436_v46 }
 0x334   :  { %v2917_v48 = vpop.eup %2916 }
 0x335   :  { %v454_v50 = vmul.f32 %v2917_v48, %v2915_v47  ;;  %v453_v51 = vmul.f32 %v2917_v48, %v329_v21 }
 0x337   :  { %456 = vrot.lane.b32.xlu1 %v454_v50, %s3139_s3 }
 0x38d   :  { %v444_v55 = vpop.permute.xlu0 %443 }
 0x38e   :  { %v445_v56 = vrot.slane %v444_v55, 1 }
 0x390   :  { %v2428_v57 = vmul.f32 -1.442695, %v445_v56 }
 0x3a9   :  { %v457_v52 = vpop.permute.xlu1 %456 }
 0x3aa   :  { %v459_v53 = vadd.f32 %v457_v52, %v453_v51 }
 0x3ac   :  { %2918 = vtanh.f32 %v459_v53 }
 0x3ad   :  { %2920 = vpow2.f32 %v2428_v57 }
 0x3b6   :  { %v2919_v54 = vpop.eup %2918 }
 0x3b7   :  { %462 = vrot.lane.b32.xlu1 %v2919_v54, %s3139_s3  ;;  %v2921_v58 = vpop.eup %2920 }
 0x3b8   :  { %v450_v59 = vadd.f32 1.0, %v2921_v58 }
 0x3ba   :  { %2922 = vrcp.f32 %v450_v59 }
 0x3c4   :  { %v2923_v60 = vpop.eup %2922 }
 0x429   :  { %v463_v61 = vpop.permute.xlu1 %462 }
 0x42a   :  { %v465_v62 = vmul.f32 %v2923_v60, %v463_v61 }
 0x42c   :  { %466 = vst.msk [vmem:[#allocation3 + $0x1] sm:$0x1] %vm336_vm1, %v465_v62  ;;  %2429 = vmatmul.mubr.msk.f32.vlgmr.msra.gmra.mrb[2].mxu1 %vm116_vm0, %v465_v62 }
 0x42d   :  { %2751 = vmatpush1.bf16.msra.mxu1 %v3264_v18  ;;  %794 = vmatprep.mubr.f32.mxu1 %v3137_v1 }
 0x42e   :  { %2753 = vmatprep.subr.bf16.mxu1 %v3266_v23 }
 0x431   :  { %2755 = vmatpush1.bf16.msra.mxu1 %v3269_v28 }
 0x432   :  { %2757 = vmatprep.subr.bf16.mxu1 %v3272_v36 }
 0x435   :  { %2759 = vmatpush1.bf16.msra.mxu1 %v3275_v44 }
 0x436   :  { %2761 = vmatprep.subr.bf16.mxu1 %v3278_v45 }
 0x439   :  { %2763 = vmatpush1.bf16.msra.mxu1 %v3281_v49 }
 0x43a   :  { %2781 = vmatprep.subr.bf16.mxu1 %v3261_v10 }
 0x4ff   :  { %v538_v63 = vpop.f32.mrb[2].mxu1 }
 0x500   :  { %v540_v2 = vpop.f32.mrb[3].mxu1 }
 0x501   :  { %v545_v3 = vcombine.low %v538_v63, %v540_v2 }
 0x503   :  { %v552_v4 = vrot.slane %v545_v3, %v3313_v0  ;;  %v726_v3 = vld [vmem:[#allocation2 + $0x4] ss:$8 sm:$0x3] }
 0x505   :  { %v559_v5 = vrot.slane %v552_v4, %v3313_v0 }
 0x507   :  { %v561_v7 = vadd.f32 %v559_v5, %v468_v6 }
 0x509   :  { %572 = vrot.lane.b32.xlu1 %v561_v7, %s3139_s3  ;;  %v2430_v8 = vmul.f32 -1.442695, %v561_v7  ;;  %v569_v9 = vrot.slane %v561_v7, 1 }
 0x50b   :  { %2924 = vpow2.f32 %v2430_v8 }
 0x50c   :  { %2926 = vtanh.f32 %v569_v9 }
 0x515   :  { %v2925_v11 = vpop.eup %2924 }
 0x516   :  { %v565_v12 = vadd.f32 1.0, %v2925_v11  ;;  %v2927_v13 = vpop.eup %2926 }
 0x518   :  { %2928 = vrcp.f32 %v565_v12 }
 0x522   :  { %v2929_v14 = vpop.eup %2928 }
 0x523   :  { %v583_v15 = vmul.f32 %v2929_v14, %v2927_v13  ;;  %v582_v16 = vmul.f32 %v2929_v14, %v459_v53 }
 0x525   :  { %585 = vrot.lane.b32.xlu0 %v583_v15, %s3139_s3 }
 0x57b   :  { %v573_v21 = vpop.permute.xlu1 %572 }
 0x57c   :  { %v574_v22 = vrot.slane %v573_v21, 1 }
 0x57e   :  { %v2431_v24 = vmul.f32 -1.442695, %v574_v22 }
 0x597   :  { %v586_v17 = vpop.permute.xlu0 %585 }
 0x598   :  { %v588_v19 = vadd.f32 %v586_v17, %v582_v16 }
 0x59a   :  { %2930 = vtanh.f32 %v588_v19 }
 0x59b   :  { %2932 = vpow2.f32 %v2431_v24 }
 0x5a4   :  { %v2931_v20 = vpop.eup %2930 }
 0x5a5   :  { %591 = vrot.lane.b32.xlu0 %v2931_v20, %s3139_s3  ;;  %v2933_v25 = vpop.eup %2932 }
 0x5a6   :  { %v579_v26 = vadd.f32 1.0, %v2933_v25 }
 0x5a8   :  { %2934 = vrcp.f32 %v579_v26 }
 0x5b2   :  { %v2935_v27 = vpop.eup %2934 }
 0x617   :  { %v592_v29 = vpop.permute.xlu0 %591 }
 0x618   :  { %v594_v30 = vmul.f32 %v2935_v27, %v592_v29 }
 0x61a   :  { %595 = vst.msk [vmem:[#allocation3 + $0x2] sm:$0x1] %vm336_vm1, %v594_v30  ;;  %2432 = vmatmul.mubr.msk.f32.vlgmr.msra.gmra.mrb[4].mxu0 %vm116_vm0, %v594_v30 }
 0x61b   :  { %2767 = vmatpush1.bf16.msra.mxu0 %v3264_v18  ;;  %923 = vmatprep.mubr.f32.mxu0 %v3137_v1 }
 0x61c   :  { %2769 = vmatprep.subr.bf16.mxu0 %v3266_v23 }
 0x61f   :  { %2771 = vmatpush1.bf16.msra.mxu0 %v3269_v28 }
 0x620   :  { %2773 = vmatprep.subr.bf16.mxu0 %v3272_v36 }
 0x623   :  { %2775 = vmatpush1.bf16.msra.mxu0 %v3275_v44 }
 0x624   :  { %2777 = vmatprep.subr.bf16.mxu0 %v3278_v45 }
 0x627   :  { %2779 = vmatpush1.bf16.msra.mxu0 %v3281_v49 }
 0x628   :  { %2797 = vmatprep.subr.bf16.mxu0 %v3261_v10 }
 0x6ed   :  { %v667_v31 = vpop.f32.mrb[4].mxu0 }
 0x6ee   :  { %v669_v32 = vpop.f32.mrb[5].mxu0 }
 0x6ef   :  { %v674_v33 = vcombine.low %v667_v31, %v669_v32  ;;  %v855_v32 = vld [vmem:[#allocation2 + $0x5] ss:$8 sm:$0x3] }
 0x6f1   :  { %v681_v34 = vrot.slane %v674_v33, %v3313_v0 }
 0x6f3   :  { %v688_v35 = vrot.slane %v681_v34, %v3313_v0 }
 0x6f5   :  { %v690_v38 = vadd.f32 %v688_v35, %v597_v37 }
 0x6f7   :  { %701 = vrot.lane.b32.xlu0 %v690_v38, %s3139_s3  ;;  %v2433_v39 = vmul.f32 -1.442695, %v690_v38  ;;  %v698_v40 = vrot.slane %v690_v38, 1 }
 0x6f9   :  { %2936 = vpow2.f32 %v2433_v39 }
 0x6fa   :  { %2938 = vtanh.f32 %v698_v40 }
 0x703   :  { %v2937_v41 = vpop.eup %2936 }
 0x704   :  { %v694_v42 = vadd.f32 1.0, %v2937_v41  ;;  %v2939_v43 = vpop.eup %2938 }
 0x706   :  { %2940 = vrcp.f32 %v694_v42 }
 0x710   :  { %v2941_v10 = vpop.eup %2940 }
 0x711   :  { %v712_v46 = vmul.f32 %v2941_v10, %v2939_v43  ;;  %v711_v47 = vmul.f32 %v2941_v10, %v588_v19 }
 0x713   :  { %714 = vrot.lane.b32.xlu1 %v712_v46, %s3139_s3 }
 0x769   :  { %v702_v52 = vpop.permute.xlu0 %701 }
 0x76a   :  { %v703_v53 = vrot.slane %v702_v52, 1 }
 0x76c   :  { %v2434_v54 = vmul.f32 -1.442695, %v703_v53 }
 0x785   :  { %v715_v48 = vpop.permute.xlu1 %714 }
 0x786   :  { %v717_v50 = vadd.f32 %v715_v48, %v711_v47 }
 0x788   :  { %2942 = vtanh.f32 %v717_v50 }
 0x789   :  { %2944 = vpow2.f32 %v2434_v54 }
 0x792   :  { %v2943_v51 = vpop.eup %2942 }
 0x793   :  { %720 = vrot.lane.b32.xlu1 %v2943_v51, %s3139_s3  ;;  %v2945_v55 = vpop.eup %2944 }
 0x794   :  { %v708_v56 = vadd.f32 1.0, %v2945_v55  ;;  %v984_v55 = vld [vmem:[#allocation2 + $0x6] ss:$8 sm:$0x3] }
 0x796   :  { %2946 = vrcp.f32 %v708_v56 }
 0x7a0   :  { %v2947_v57 = vpop.eup %2946 }
 0x805   :  { %v721_v58 = vpop.permute.xlu1 %720 }
 0x806   :  { %v723_v59 = vmul.f32 %v2947_v57, %v721_v58 }
 0x808   :  { %724 = vst.msk [vmem:[#allocation3 + $0x3] sm:$0x1] %vm336_vm1, %v723_v59  ;;  %2435 = vmatmul.mubr.msk.f32.vlgmr.msra.gmra.mrb[4].mxu1 %vm116_vm0, %v723_v59 }
 0x809   :  { %2783 = vmatpush1.bf16.msra.mxu1 %v3264_v18  ;;  %1052 = vmatprep.mubr.f32.mxu1 %v3137_v1 }
 0x80a   :  { %2785 = vmatprep.subr.bf16.mxu1 %v3266_v23 }
 0x80d   :  { %2787 = vmatpush1.bf16.msra.mxu1 %v3269_v28 }
 0x80e   :  { %2789 = vmatprep.subr.bf16.mxu1 %v3272_v36 }
 0x811   :  { %2791 = vmatpush1.bf16.msra.mxu1 %v3275_v44 }
 0x812   :  { %2793 = vmatprep.subr.bf16.mxu1 %v3278_v45 }
 0x815   :  { %2795 = vmatpush1.bf16.msra.mxu1 %v3281_v49 }
 0x8db   :  { %v796_v60 = vpop.f32.mrb[4].mxu1 }
 0x8dc   :  { %v798_v61 = vpop.f32.mrb[5].mxu1 }
 0x8dd   :  { %v803_v62 = vcombine.low %v796_v60, %v798_v61 }
 0x8df   :  { %v810_v63 = vrot.slane %v803_v62, %v3313_v0 }
 0x8e1   :  { %v817_v2 = vrot.slane %v810_v63, %v3313_v0 }
 0x8e3   :  { %v819_v4 = vadd.f32 %v817_v2, %v726_v3 }
 0x8e5   :  { %830 = vrot.lane.b32.xlu1 %v819_v4, %s3139_s3  ;;  %v2436_v5 = vmul.f32 -1.442695, %v819_v4  ;;  %v827_v6 = vrot.slane %v819_v4, 1 }
 0x8e7   :  { %2948 = vpow2.f32 %v2436_v5 }
 0x8e8   :  { %2950 = vtanh.f32 %v827_v6 }
 0x8f1   :  { %v2949_v7 = vpop.eup %2948 }
 0x8f2   :  { %v823_v8 = vadd.f32 1.0, %v2949_v7  ;;  %v2951_v9 = vpop.eup %2950 }
 0x8f4   :  { %2952 = vrcp.f32 %v823_v8 }
 0x8fe   :  { %v2953_v11 = vpop.eup %2952 }
 0x8ff   :  { %v841_v12 = vmul.f32 %v2953_v11, %v2951_v9  ;;  %v840_v13 = vmul.f32 %v2953_v11, %v717_v50 }
 0x901   :  { %843 = vrot.lane.b32.xlu0 %v841_v12, %s3139_s3 }
 0x957   :  { %v831_v17 = vpop.permute.xlu1 %830 }
 0x958   :  { %v832_v19 = vrot.slane %v831_v17, 1 }
 0x95a   :  { %v2437_v20 = vmul.f32 -1.442695, %v832_v19 }
 0x973   :  { %v844_v14 = vpop.permute.xlu0 %843 }
 0x974   :  { %v846_v15 = vadd.f32 %v844_v14, %v840_v13 }
 0x976   :  { %2954 = vtanh.f32 %v846_v15 }
 0x977   :  { %2956 = vpow2.f32 %v2437_v20 }
 0x980   :  { %v2955_v16 = vpop.eup %2954 }
 0x981   :  { %849 = vrot.lane.b32.xlu0 %v2955_v16, %s3139_s3  ;;  %v2957_v21 = vpop.eup %2956 }
 0x982   :  { %v837_v22 = vadd.f32 1.0, %v2957_v21  ;;  %v1113_v21 = vld [vmem:[#allocation2 + $0x7] ss:$8 sm:$0x3] }
 0x984   :  { %2958 = vrcp.f32 %v837_v22 }
 0x98e   :  { %v2959_v24 = vpop.eup %2958 }
 0x9f3   :  { %v850_v25 = vpop.permute.xlu0 %849 }
 0x9f4   :  { %v852_v26 = vmul.f32 %v2959_v24, %v850_v25 }
 0x9f6   :  { %853 = vst.msk [vmem:[#allocation3 + $0x4] sm:$0x1] %vm336_vm1, %v852_v26  ;;  %2438 = vmatmul.mubr.msk.f32.vlgmr.msra.gmra.mrb[6].mxu0 %vm116_vm0, %v852_v26 }
 0x9f7   :  { %2799 = vmatpush1.bf16.msra.mxu0 %v3264_v18  ;;  %1181 = vmatprep.mubr.f32.mxu0 %v3137_v1 }
 0x9f8   :  { %2801 = vmatprep.subr.bf16.mxu0 %v3266_v23 }
 0x9fb   :  { %2803 = vmatpush1.bf16.msra.mxu0 %v3269_v28 }
 0x9fc   :  { %2805 = vmatprep.subr.bf16.mxu0 %v3272_v36 }
 0x9ff   :  { %2807 = vmatpush1.bf16.msra.mxu0 %v3275_v44 }
 0xa00   :  { %2809 = vmatprep.subr.bf16.mxu0 %v3278_v45 }
 0xa03   :  { %2811 = vmatpush1.bf16.msra.mxu0 %v3281_v49 }
 0xac9   :  { %v925_v27 = vpop.f32.mrb[6].mxu0 }
 0xaca   :  { %v927_v29 = vpop.f32.mrb[7].mxu0 }
 0xacb   :  { %v932_v30 = vcombine.low %v925_v27, %v927_v29 }
 0xacd   :  { %v939_v31 = vrot.slane %v932_v30, %v3313_v0 }
 0xacf   :  { %v946_v18 = vrot.slane %v939_v31, %v3313_v0 }
 0xad1   :  { %v948_v33 = vadd.f32 %v946_v18, %v855_v32  ;;  %v1243_v18 = vld [vmem:[%s3603_s4 + $0x8] sm:$0xff]  ;;  %v1244_v32 = vld [vmem:[%s3603_s4 + $0x10] sm:$0xff] }
 0xad3   :  { %959 = vrot.lane.b32.xlu0 %v948_v33, %s3139_s3  ;;  %v2439_v23 = vmul.f32 -1.442695, %v948_v33  ;;  %v956_v28 = vrot.slane %v948_v33, 1  ;;  %v3140_v33 = vmov 0.0|0.0  }
 0xad4   :  { %2812 = vmatprep.subr.bf16.mxu1 %v3140_v33  ;;  %2824 = vmatprep.subr.bf16.mxu0 %v3140_v33 }
 0xad5   :  { %2960 = vpow2.f32 %v2439_v23 }
 0xad6   :  { %2962 = vtanh.f32 %v956_v28  ;;  %v1245_v28 = vld [vmem:[%s3603_s4 + $0x18] sm:$0xff] }
 0xadf   :  { %v2961_v36 = vpop.eup %2960 }
 0xae0   :  { %v952_v44 = vadd.f32 1.0, %v2961_v36  ;;  %v2963_v45 = vpop.eup %2962  ;;  %v2816_v36 = vpack.c.bf16 %v1245_v28, %v1244_v32 }
 0xae2   :  { %2964 = vrcp.f32 %v952_v44 }
 0xaec   :  { %v2965_v49 = vpop.eup %2964 }
 0xaed   :  { %v970_v34 = vmul.f32 %v2965_v49, %v2963_v45  ;;  %v969_v35 = vmul.f32 %v2965_v49, %v846_v15 }
 0xaef   :  { %972 = vrot.lane.b32.xlu1 %v970_v34, %s3139_s3  ;;  %v1246_v34 = vld [vmem:[%s3603_s4 + $0x20] sm:$0xff] }
 0xb45   :  { %v960_v40 = vpop.permute.xlu0 %959 }
 0xb46   :  { %v961_v41 = vrot.slane %v960_v40, 1 }
 0xb48   :  { %v2440_v42 = vmul.f32 -1.442695, %v961_v41  ;;  %v1331_v41 = vld [vmem:[%s3604_s5] sm:$0xff] }
 0xb61   :  { %v973_v37 = vpop.permute.xlu1 %972 }
 0xb62   :  { %v975_v38 = vadd.f32 %v973_v37, %v969_v35  ;;  %v1247_v35 = vld [vmem:[%s3603_s4 + $0x28] sm:$0xff]  ;;  %v1248_v37 = vld [vmem:[%s3603_s4 + $0x30] sm:$0xff] }
 0xb64   :  { %2966 = vtanh.f32 %v975_v38 }
 0xb65   :  { %2968 = vpow2.f32 %v2440_v42  ;;  %v1332_v42 = vld [vmem:[%s3604_s5 + $0x8] sm:$0xff] }
 0xb6e   :  { %v2967_v39 = vpop.eup %2966 }
 0xb6f   :  { %978 = vrot.lane.b32.xlu1 %v2967_v39, %s3139_s3  ;;  %v2969_v43 = vpop.eup %2968  ;;  %v1249_v39 = vld [vmem:[%s3603_s4 + $0x38] sm:$0xff] }
 0xb70   :  { %v966_v10 = vadd.f32 1.0, %v2969_v43  ;;  %v2822_v40 = vpack.c.bf16 %v1249_v39, %v1248_v37  ;;  %v1333_v43 = vld [vmem:[%s3604_s5 + $0x10] sm:$0xff] }
 0xb72   :  { %2970 = vrcp.f32 %v966_v10  ;;  %v3454_v10 = vpack.c.bf16 %v1332_v42, %v1331_v41 }
 0xb7c   :  { %v2971_v46 = vpop.eup %2970 }
 0xbe1   :  { %v979_v47 = vpop.permute.xlu1 %978 }
 0xbe2   :  { %v981_v48 = vmul.f32 %v2971_v46, %v979_v47  ;;  %v1334_v46 = vld [vmem:[%s3604_s5 + $0x18] sm:$0xff] }
 0xbe4   :  { %982 = vst.msk [vmem:[#allocation3 + $0x5] sm:$0x1] %vm336_vm1, %v981_v48  ;;  %2441 = vmatmul.mubr.msk.f32.vlgmr.msra.gmra.mrb[6].mxu1 %vm116_vm0, %v981_v48  ;;  %v3461_v48 = vpack.c.bf16 %v1334_v46, %v1333_v43 }
 0xbe5   :  { %2548 = vmatprep.mubr.msk.f32.mxu1 %vm3141_vm2, %v3137_v1 }
 0xcb7   :  { %v1054_v50 = vpop.f32.mrb[6].mxu1 }
 0xcb8   :  { %v1056_v51 = vpop.f32.mrb[7].mxu1 }
 0xcb9   :  { %v1061_v52 = vcombine.low %v1054_v50, %v1056_v51 }
 0xcbb   :  { %v1068_v53 = vrot.slane %v1061_v52, %v3313_v0 }
 0xcbd   :  { %v1075_v54 = vrot.slane %v1068_v53, %v3313_v0 }
 0xcbf   :  { %v1077_v56 = vadd.f32 %v1075_v54, %v984_v55 }
 0xcc1   :  { %1088 = vrot.lane.b32.xlu1 %v1077_v56, %s3139_s3  ;;  %v2442_v57 = vmul.f32 -1.442695, %v1077_v56  ;;  %v1085_v58 = vrot.slane %v1077_v56, 1 }
 0xcc3   :  { %2972 = vpow2.f32 %v2442_v57 }
 0xcc4   :  { %2974 = vtanh.f32 %v1085_v58 }
 0xccd   :  { %v2973_v59 = vpop.eup %2972 }
 0xcce   :  { %v1081_v60 = vadd.f32 1.0, %v2973_v59  ;;  %v2975_v61 = vpop.eup %2974 }
 0xcd0   :  { %2976 = vrcp.f32 %v1081_v60 }
 0xcda   :  { %v2977_v62 = vpop.eup %2976 }
 0xcdb   :  { %v1099_v63 = vmul.f32 %v2977_v62, %v2975_v61  ;;  %v1098_v2 = vmul.f32 %v2977_v62, %v975_v38  ;;  %v2819_v38 = vpack.c.bf16 %v1247_v35, %v1246_v34  ;;  %v2447_v61 = vld [vmem:[%s3605_s6] ss:$0 sm:$0xff] }
 0xcdd   :  { %1101 = vrot.lane.b32.xlu0 %v1099_v63, %s3139_s3 }
 0xd33   :  { %v1089_v6 = vpop.permute.xlu1 %1088 }
 0xd34   :  { %v1090_v7 = vrot.slane %v1089_v6, 1 }
 0xd36   :  { %v2443_v8 = vmul.f32 -1.442695, %v1090_v7 }
 0xd4f   :  { %v1102_v3 = vpop.permute.xlu0 %1101 }
 0xd50   :  { %v1104_v4 = vadd.f32 %v1102_v3, %v1098_v2 }
 0xd52   :  { %2978 = vtanh.f32 %v1104_v4 }
 0xd53   :  { %2980 = vpow2.f32 %v2443_v8 }
 0xd5c   :  { %v2979_v5 = vpop.eup %2978 }
 0xd5d   :  { %1107 = vrot.lane.b32.xlu0 %v2979_v5, %s3139_s3  ;;  %v2981_v9 = vpop.eup %2980 }
 0xd5e   :  { %v1095_v11 = vadd.f32 1.0, %v2981_v9 }
 0xd60   :  { %2982 = vrcp.f32 %v1095_v11 }
 0xd6a   :  { %v2983_v12 = vpop.eup %2982 }
 0xdcf   :  { %v1108_v13 = vpop.permute.xlu0 %1107 }
 0xdd0   :  { %v1110_v14 = vmul.f32 %v2983_v12, %v1108_v13 }
 0xdd2   :  { %1111 = vst.msk [vmem:[#allocation3 + $0x6] sm:$0x1] %vm336_vm1, %v1110_v14  ;;  %2444 = vmatmul.mubr.msk.f32.vlgmr.msra.gmra.mrb[8].mxu0 %vm116_vm0, %v1110_v14 }
 0xdd3   :  { %2559 = vmatprep.mubr.msk.f32.mxu0 %vm3141_vm2, %v3137_v1  ;;  %2826 = vmatpush3.bf16.msra.mxu0 %v3454_v10 }
 0xdd4   :  { %2827 = vmatprep.subr.bf16.mxu0 %v3140_v33 }
 0xdd7   :  { %2829 = vmatpush3.bf16.msra.mxu0 %v3461_v48 }
 0xdd8   :  { %2836 = vmatprep.subr.bf16.mxu0 %v3140_v33 }
 0xdda   :  { %2560 = vmatmul.mubr.f32.vlgmr.msra.gmra.mrb[10].mxu0 %v3137_v1 }
 0xddb   :  { %2838 = vmatpush3.bf16.msra.mxu0 %v3454_v10  ;;  %2581 = vmatprep.mubr.msk.f32.mxu0 %vm3141_vm2, %v3137_v1 }
 0xddc   :  { %2839 = vmatprep.subr.bf16.mxu0 %v3140_v33 }
 0xddf   :  { %2841 = vmatpush3.bf16.msra.mxu0 %v3461_v48 }
 0xde0   :  { %2848 = vmatprep.subr.bf16.mxu0 %v3140_v33 }
 0xea5   :  { %v1183_v15 = vpop.f32.mrb[8].mxu0 }
 0xea6   :  { %v1185_v16 = vpop.f32.mrb[9].mxu0 }
 0xea7   :  { %v1190_v17 = vcombine.low %v1183_v15, %v1185_v16 }
 0xea9   :  { %v1197_v19 = vrot.slane %v1190_v17, %v3313_v0 }
 0xeab   :  { %v1204_v20 = vrot.slane %v1197_v19, %v3313_v0  ;;  %v1242_v0 = vld [vmem:[%s3603_s4] sm:$0xff] }
 0xeac   :  { %v2813_v23 = vpack.c.bf16 %v1243_v18, %v1242_v0 }
 0xead   :  { %v1206_v22 = vadd.f32 %v1204_v20, %v1113_v21  ;;  %v1405_v59 = vpop.f32.mrb[10].mxu0 }
 0xeae   :  { %2814 = vmatpush3.bf16.msra.mxu1 %v2813_v23  ;;  %v2561_v60 = vpop.f32.mrb[11].mxu0 }
 0xeaf   :  { %1217 = vrot.lane.b32.xlu0 %v1206_v22, %s3139_s3  ;;  %v2445_v24 = vmul.f32 -1.442695, %v1206_v22  ;;  %v1214_v25 = vrot.slane %v1206_v22, 1  ;;  %2815 = vmatprep.subr.bf16.mxu1 %v3140_v33 }
 0xeb1   :  { %2984 = vpow2.f32 %v2445_v24 }
 0xeb2   :  { %2986 = vtanh.f32 %v1214_v25  ;;  %2817 = vmatpush3.bf16.msra.mxu1 %v2816_v36 }
 0xeb3   :  { %2818 = vmatprep.subr.bf16.mxu1 %v3140_v33 }
 0xeb6   :  { %2820 = vmatpush3.bf16.msra.mxu1 %v2819_v38 }
 0xeb7   :  { %2821 = vmatprep.subr.bf16.mxu1 %v3140_v33 }
 0xeba   :  { %2823 = vmatpush3.bf16.msra.mxu1 %v2822_v40 }
 0xebb   :  { %v2985_v26 = vpop.eup %2984  ;;  %2830 = vmatprep.subr.bf16.mxu1 %v3140_v33 }
 0xebc   :  { %v1210_v27 = vadd.f32 1.0, %v2985_v26  ;;  %v2987_v29 = vpop.eup %2986 }
 0xebe   :  { %2988 = vrcp.f32 %v1210_v27 }
 0xec8   :  { %v2989_v30 = vpop.eup %2988 }
 0xec9   :  { %v1228_v31 = vmul.f32 %v2989_v30, %v2987_v29  ;;  %v1227_v44 = vmul.f32 %v2989_v30, %v1104_v4 }
 0xecb   :  { %1230 = vrot.lane.b32.xlu1 %v1228_v31, %s3139_s3 }
 0xf21   :  { %v1218_v50 = vpop.permute.xlu0 %1217 }
 0xf22   :  { %v1219_v51 = vrot.slane %v1218_v50, 1 }
 0xf24   :  { %v2446_v52 = vmul.f32 -1.442695, %v1219_v51 }
 0xf3d   :  { %v1231_v45 = vpop.permute.xlu1 %1230 }
 0xf3e   :  { %v1233_v49 = vadd.f32 %v1231_v45, %v1227_v44 }
 0xf40   :  { %2990 = vtanh.f32 %v1233_v49 }
 0xf41   :  { %2992 = vpow2.f32 %v2446_v52 }
 0xf4a   :  { %v2991_v47 = vpop.eup %2990 }
 0xf4b   :  { %1236 = vrot.lane.b32.xlu1 %v2991_v47, %s3139_s3  ;;  %v2993_v53 = vpop.eup %2992 }
 0xf4c   :  { %v1224_v54 = vadd.f32 1.0, %v2993_v53 }
 0xf4e   :  { %2994 = vrcp.f32 %v1224_v54 }
 0xf58   :  { %v2995_v55 = vpop.eup %2994 }
 0xfbd   :  { %v1237_v56 = vpop.permute.xlu1 %1236 }
 0xfbe   :  { %v1239_v57 = vmul.f32 %v2995_v55, %v1237_v56 }
 0xfc0   :  { %1240 = vst.msk [vmem:[#allocation3 + $0x7] sm:$0x1] %vm336_vm1, %v1239_v57 }
 0xfc7   :  { %v1241_v58 = vld [vmem:[#allocation3] sm:$0xff] }
 0xfc8   :  { %2549 = vmatmul.mubr.msk.f32.vlgmr.msra.gmra.mrb[8].mxu1 %vm116_vm0, %v1241_v58 }
 0xfc9   :  { %2832 = vmatpush3.bf16.msra.mxu1 %v3454_v10  ;;  %2570 = vmatprep.mubr.msk.f32.mxu1 %vm3141_vm2, %v3137_v1 }
 0xfca   :  { %2833 = vmatprep.subr.bf16.mxu1 %v3140_v33 }
 0xfcd   :  { %2835 = vmatpush3.bf16.msra.mxu1 %v3461_v48 }
 0xfce   :  { %2842 = vmatprep.subr.bf16.mxu1 %v3140_v33 }
0x109b   :  { %v1326_v62 = vpop.f32.mrb[8].mxu1 }
0x109c   :  { %v1327_v63 = vadd.f32 %v2447_v61, %v1326_v62  ;;  %v2550_v2 = vpop.f32.mrb[9].mxu1 }
0x109e   :  { %1330 = vst [vmem:[#allocation4] sm:$0xff] %v1327_v63 }
0x10a5   :  { %v1335_v3 = vld [vmem:[#allocation4] sm:$0x1]  ;;  %v1440_v21 = vld [vmem:[#allocation4 + $0x1] sm:$0x1]  ;;  %v1543_v34 = vld [vmem:[#allocation4 + $0x2] sm:$0x1] }
0x10a6   :  { %v1409_v4 = vadd.f32 %v1405_v59, %v1335_v3  ;;  %v1646_v57 = vld [vmem:[#allocation4 + $0x3] sm:$0x1] }
0x10a8   :  { %2996 = vtanh.f32 %v1409_v4  ;;  %v2449_v6 = vmul.f32 -1.442695, %v1409_v4 }
0x10aa   :  { %2998 = vpow2.f32 %v2449_v6 }
0x10b2   :  { %v2997_v5 = vpop.eup %2996 }
0x10b3   :  { %1419 = vrot.lane.b32.xlu0 %v2997_v5, %s3139_s3 }
0x10b4   :  { %v2999_v7 = vpop.eup %2998 }
0x10b5   :  { %v1413_v8 = vadd.f32 1.0, %v2999_v7 }
0x10b7   :  { %3000 = vrcp.f32 %v1413_v8 }
0x10c1   :  { %v3001_v9 = vpop.eup %3000 }
0x10c2   :  { %v1417_v13 = vmul.f32 0.0, %v3001_v9 }
0x1125   :  { %v1420_v11 = vpop.permute.xlu0 %1419 }
0x1126   :  { %v1422_v12 = vmul.f32 %v3001_v9, %v1420_v11 }
0x1128   :  { %1424 = vrot.lane.b32.xlu1 %v1422_v12, %s3142_s2 }
0x119a   :  { %v1425_v14 = vpop.permute.xlu1 %1424 }
0x119b   :  { %v1427_v15 = vadd.f32 %v1425_v14, %v1417_v13  ;;  %v1749_v14 = vld [vmem:[#allocation4 + $0x4] sm:$0x1] }
0x119d   :  { %3002 = vtanh.f32 %v1427_v15 }
0x11a7   :  { %v3003_v16 = vpop.eup %3002 }
0x11a8   :  { %1430 = vrot.lane.b32.xlu0 %v3003_v16, %s3139_s3 }
0x121a   :  { %v1431_v17 = vpop.permute.xlu0 %1430 }
0x121b   :  { %v1433_v19 = vmul.f32 %v3001_v9, %v1431_v17 }
0x121d   :  { %1435 = vrot.lane.b32.xlu1 %v1433_v19, %s3142_s2 }
0x128f   :  { %v1436_v20 = vpop.permute.xlu1 %1435 }
0x1290   :  { %1439 = vst.msk [vmem:[#allocation5] sm:$0x1] %vm1438_vm3, %v1436_v20  ;;  %2571 = vmatmul.mubr.msk.f32.vlgmr.msra.gmra.mrb[10].mxu1 %vm1336_vm4, %v1436_v20 }
0x1291   :  { %2844 = vmatpush3.bf16.msra.mxu1 %v3454_v10  ;;  %2592 = vmatprep.mubr.msk.f32.mxu1 %vm3141_vm2, %v3137_v1 }
0x1292   :  { %2845 = vmatprep.subr.bf16.mxu1 %v3140_v33 }
0x1295   :  { %2847 = vmatpush3.bf16.msra.mxu1 %v3461_v48 }
0x1296   :  { %2854 = vmatprep.subr.bf16.mxu1 %v3140_v33 }
0x1363   :  { %v1509_v22 = vpop.f32.mrb[10].mxu1 }
0x1364   :  { %v1513_v24 = vadd.f32 %v1509_v22, %v1440_v21  ;;  %v2572_v25 = vpop.f32.mrb[11].mxu1 }
0x1366   :  { %3004 = vtanh.f32 %v1513_v24  ;;  %v2451_v27 = vmul.f32 -1.442695, %v1513_v24 }
0x1368   :  { %3006 = vpow2.f32 %v2451_v27 }
0x1370   :  { %v3005_v26 = vpop.eup %3004 }
0x1371   :  { %1523 = vrot.lane.b32.xlu0 %v3005_v26, %s3139_s3 }
0x1372   :  { %v3007_v29 = vpop.eup %3006 }
0x1373   :  { %v1517_v30 = vadd.f32 1.0, %v3007_v29 }
0x1375   :  { %3008 = vrcp.f32 %v1517_v30 }
0x137f   :  { %v3009_v31 = vpop.eup %3008 }
0x1380   :  { %v1521_v32 = vmul.f32 %v3009_v31, %v1427_v15 }
0x13e3   :  { %v1524_v0 = vpop.permute.xlu0 %1523 }
0x13e4   :  { %v1526_v18 = vmul.f32 %v3009_v31, %v1524_v0 }
0x13e6   :  { %1528 = vrot.lane.b32.xlu1 %v1526_v18, %s3142_s2 }
0x1458   :  { %v1529_v23 = vpop.permute.xlu1 %1528 }
0x1459   :  { %v1531_v28 = vadd.f32 %v1529_v23, %v1521_v32  ;;  %v1852_v23 = vld [vmem:[#allocation4 + $0x5] sm:$0x1] }
0x145b   :  { %3010 = vtanh.f32 %v1531_v28 }
0x1465   :  { %v3011_v36 = vpop.eup %3010 }
0x1466   :  { %1534 = vrot.lane.b32.xlu0 %v3011_v36, %s3139_s3 }
0x14d8   :  { %v1535_v44 = vpop.permute.xlu0 %1534 }
0x14d9   :  { %v1537_v45 = vmul.f32 %v3009_v31, %v1535_v44 }
0x14db   :  { %1539 = vrot.lane.b32.xlu1 %v1537_v45, %s3142_s2 }
0x154d   :  { %v1540_v49 = vpop.permute.xlu1 %1539 }
0x154e   :  { %1542 = vst.msk [vmem:[#allocation5 + $0x1] sm:$0x1] %vm1438_vm3, %v1540_v49  ;;  %2582 = vmatmul.mubr.msk.f32.vlgmr.msra.gmra.mrb[12].mxu0 %vm1336_vm4, %v1540_v49 }
0x154f   :  { %2850 = vmatpush3.bf16.msra.mxu0 %v3454_v10  ;;  %2603 = vmatprep.mubr.msk.f32.mxu0 %vm3141_vm2, %v3137_v1 }
0x1550   :  { %2851 = vmatprep.subr.bf16.mxu0 %v3140_v33 }
0x1553   :  { %2853 = vmatpush3.bf16.msra.mxu0 %v3461_v48 }
0x1554   :  { %2860 = vmatprep.subr.bf16.mxu0 %v3140_v33 }
0x1621   :  { %v1612_v35 = vpop.f32.mrb[12].mxu0 }
0x1622   :  { %v1616_v37 = vadd.f32 %v1612_v35, %v1543_v34  ;;  %v2583_v38 = vpop.f32.mrb[13].mxu0 }
0x1624   :  { %3012 = vtanh.f32 %v1616_v37  ;;  %v2453_v40 = vmul.f32 -1.442695, %v1616_v37 }
0x1626   :  { %3014 = vpow2.f32 %v2453_v40 }
0x162e   :  { %v3013_v39 = vpop.eup %3012 }
0x162f   :  { %1626 = vrot.lane.b32.xlu0 %v3013_v39, %s3139_s3 }
0x1630   :  { %v3015_v41 = vpop.eup %3014 }
0x1631   :  { %v1620_v42 = vadd.f32 1.0, %v3015_v41 }
0x1633   :  { %3016 = vrcp.f32 %v1620_v42 }
0x163d   :  { %v3017_v43 = vpop.eup %3016 }
0x163e   :  { %v1624_v50 = vmul.f32 %v3017_v43, %v1531_v28 }
0x16a1   :  { %v1627_v46 = vpop.permute.xlu0 %1626 }
0x16a2   :  { %v1629_v47 = vmul.f32 %v3017_v43, %v1627_v46 }
0x16a4   :  { %1631 = vrot.lane.b32.xlu1 %v1629_v47, %s3142_s2  ;;  %v1955_v47 = vld [vmem:[#allocation4 + $0x6] sm:$0x1] }
0x1716   :  { %v1632_v51 = vpop.permute.xlu1 %1631 }
0x1717   :  { %v1634_v52 = vadd.f32 %v1632_v51, %v1624_v50 }
0x1719   :  { %3018 = vtanh.f32 %v1634_v52 }
0x1723   :  { %v3019_v53 = vpop.eup %3018 }
0x1724   :  { %1637 = vrot.lane.b32.xlu0 %v3019_v53, %s3139_s3 }
0x1796   :  { %v1638_v54 = vpop.permute.xlu0 %1637 }
0x1797   :  { %v1640_v55 = vmul.f32 %v3017_v43, %v1638_v54 }
0x1799   :  { %1642 = vrot.lane.b32.xlu1 %v1640_v55, %s3142_s2 }
0x180b   :  { %v1643_v56 = vpop.permute.xlu1 %1642 }
0x180c   :  { %1645 = vst.msk [vmem:[#allocation5 + $0x2] sm:$0x1] %vm1438_vm3, %v1643_v56  ;;  %2593 = vmatmul.mubr.msk.f32.vlgmr.msra.gmra.mrb[12].mxu1 %vm1336_vm4, %v1643_v56 }
0x180d   :  { %2856 = vmatpush3.bf16.msra.mxu1 %v3454_v10  ;;  %2614 = vmatprep.mubr.msk.f32.mxu1 %vm3141_vm2, %v3137_v1 }
0x180e   :  { %2857 = vmatprep.subr.bf16.mxu1 %v3140_v33 }
0x1811   :  { %2859 = vmatpush3.bf16.msra.mxu1 %v3461_v48 }
0x1812   :  { %2866 = vmatprep.subr.bf16.mxu1 %v3140_v33 }
0x18df   :  { %v1715_v58 = vpop.f32.mrb[12].mxu1 }
0x18e0   :  { %v1719_v59 = vadd.f32 %v1715_v58, %v1646_v57  ;;  %v2594_v60 = vpop.f32.mrb[13].mxu1 }
0x18e2   :  { %3020 = vtanh.f32 %v1719_v59  ;;  %v2455_v62 = vmul.f32 -1.442695, %v1719_v59 }
0x18e4   :  { %3022 = vpow2.f32 %v2455_v62 }
0x18ec   :  { %v3021_v61 = vpop.eup %3020 }
0x18ed   :  { %1729 = vrot.lane.b32.xlu0 %v3021_v61, %s3139_s3 }
0x18ee   :  { %v3023_v63 = vpop.eup %3022 }
0x18ef   :  { %v1723_v2 = vadd.f32 1.0, %v3023_v63 }
0x18f1   :  { %3024 = vrcp.f32 %v1723_v2 }
0x18fb   :  { %v3025_v3 = vpop.eup %3024 }
0x18fc   :  { %v1727_v6 = vmul.f32 %v3025_v3, %v1634_v52 }
0x195f   :  { %v1730_v4 = vpop.permute.xlu0 %1729 }
0x1960   :  { %v1732_v5 = vmul.f32 %v3025_v3, %v1730_v4 }
0x1962   :  { %1734 = vrot.lane.b32.xlu1 %v1732_v5, %s3142_s2  ;;  %v2058_v5 = vld [vmem:[#allocation4 + $0x7] sm:$0x1] }
0x19d4   :  { %v1735_v7 = vpop.permute.xlu1 %1734 }
0x19d5   :  { %v1737_v8 = vadd.f32 %v1735_v7, %v1727_v6 }
0x19d7   :  { %3026 = vtanh.f32 %v1737_v8 }
0x19e1   :  { %v3027_v9 = vpop.eup %3026 }
0x19e2   :  { %1740 = vrot.lane.b32.xlu0 %v3027_v9, %s3139_s3 }
0x1a54   :  { %v1741_v11 = vpop.permute.xlu0 %1740 }
0x1a55   :  { %v1743_v12 = vmul.f32 %v3025_v3, %v1741_v11 }
0x1a57   :  { %1745 = vrot.lane.b32.xlu1 %v1743_v12, %s3142_s2 }
0x1ac9   :  { %v1746_v13 = vpop.permute.xlu1 %1745 }
0x1aca   :  { %1748 = vst.msk [vmem:[#allocation5 + $0x3] sm:$0x1] %vm1438_vm3, %v1746_v13  ;;  %2604 = vmatmul.mubr.msk.f32.vlgmr.msra.gmra.mrb[14].mxu0 %vm1336_vm4, %v1746_v13 }
0x1acb   :  { %2862 = vmatpush3.bf16.msra.mxu0 %v3454_v10  ;;  %2625 = vmatprep.mubr.msk.f32.mxu0 %vm3141_vm2, %v3137_v1 }
0x1acc   :  { %2863 = vmatprep.subr.bf16.mxu0 %v3140_v33 }
0x1acf   :  { %2865 = vmatpush3.bf16.msra.mxu0 %v3461_v48 }
0x1ad0   :  { %2872 = vmatprep.subr.bf16.mxu0 %v3140_v33 }
0x1b9d   :  { %v1818_v15 = vpop.f32.mrb[14].mxu0 }
0x1b9e   :  { %v1822_v16 = vadd.f32 %v1818_v15, %v1749_v14  ;;  %v2605_v17 = vpop.f32.mrb[15].mxu0 }
0x1ba0   :  { %3028 = vtanh.f32 %v1822_v16  ;;  %v2457_v20 = vmul.f32 -1.442695, %v1822_v16 }
0x1ba2   :  { %3030 = vpow2.f32 %v2457_v20 }
0x1baa   :  { %v3029_v19 = vpop.eup %3028 }
0x1bab   :  { %1832 = vrot.lane.b32.xlu0 %v3029_v19, %s3139_s3 }
0x1bac   :  { %v3031_v21 = vpop.eup %3030 }
0x1bad   :  { %v1826_v22 = vadd.f32 1.0, %v3031_v21 }
0x1baf   :  { %3032 = vrcp.f32 %v1826_v22  ;;  %v2162_v22 = vld [vmem:[#allocation11] sm:$0xff] }
0x1bb9   :  { %v3033_v24 = vpop.eup %3032 }
0x1bba   :  { %v1830_v27 = vmul.f32 %v3033_v24, %v1737_v8 }
0x1c1d   :  { %v1833_v25 = vpop.permute.xlu0 %1832 }
0x1c1e   :  { %v1835_v26 = vmul.f32 %v3033_v24, %v1833_v25  ;;  %v2164_v25 = vld [vmem:[#allocation11 + $0x10] sm:$0xff] }
0x1c20   :  { %1837 = vrot.lane.b32.xlu1 %v1835_v26, %s3142_s2 }
0x1c92   :  { %v1838_v29 = vpop.permute.xlu1 %1837 }
0x1c93   :  { %v1840_v30 = vadd.f32 %v1838_v29, %v1830_v27  ;;  %v2165_v27 = vld [vmem:[#allocation11 + $0x18] sm:$0xff] }
0x1c94   :  { %v2876_v29 = vpack.c.bf16 %v2165_v27, %v2164_v25 }
0x1c95   :  { %3034 = vtanh.f32 %v1840_v30 }
0x1c9f   :  { %v3035_v31 = vpop.eup %3034 }
0x1ca0   :  { %1843 = vrot.lane.b32.xlu0 %v3035_v31, %s3139_s3  ;;  %v2248_v31 = vld [vmem:[%s3608_s9 + $0x8] sm:$0xff] }
0x1d12   :  { %v1844_v0 = vpop.permute.xlu0 %1843 }
0x1d13   :  { %v1846_v18 = vmul.f32 %v3033_v24, %v1844_v0  ;;  %v2163_v24 = vld [vmem:[#allocation11 + $0x8] sm:$0xff] }
0x1d14   :  { %v2873_v26 = vpack.c.bf16 %v2163_v24, %v2162_v22 }
0x1d15   :  { %1848 = vrot.lane.b32.xlu1 %v1846_v18, %s3142_s2 }
0x1d87   :  { %v1849_v32 = vpop.permute.xlu1 %1848 }
0x1d88   :  { %1851 = vst.msk [vmem:[#allocation5 + $0x4] sm:$0x1] %vm1438_vm3, %v1849_v32  ;;  %2615 = vmatmul.mubr.msk.f32.vlgmr.msra.gmra.mrb[14].mxu1 %vm1336_vm4, %v1849_v32 }
0x1d89   :  { %2868 = vmatpush3.bf16.msra.mxu1 %v3454_v10  ;;  %2636 = vmatprep.mubr.msk.f32.mxu1 %vm3141_vm2, %v3137_v1 }
0x1d8a   :  { %2869 = vmatprep.subr.bf16.mxu1 %v3140_v33 }
0x1d8d   :  { %2871 = vmatpush3.bf16.msra.mxu1 %v3461_v48 }
0x1d8e   :  { %2878 = vmatprep.subr.bf16.mxu1 %v3140_v33 }
0x1e5b   :  { %v1921_v28 = vpop.f32.mrb[14].mxu1 }
0x1e5c   :  { %v1925_v36 = vadd.f32 %v1921_v28, %v1852_v23  ;;  %v2616_v44 = vpop.f32.mrb[15].mxu1 }
0x1e5d   :  { %v2250_v44 = vld [vmem:[%s3608_s9 + $0x18] sm:$0xff] }
0x1e5e   :  { %3036 = vtanh.f32 %v1925_v36  ;;  %v2459_v49 = vmul.f32 -1.442695, %v1925_v36  ;;  %v2249_v36 = vld [vmem:[%s3608_s9 + $0x10] sm:$0xff] }
0x1e60   :  { %3038 = vpow2.f32 %v2459_v49 }
0x1e68   :  { %v3037_v45 = vpop.eup %3036 }
0x1e69   :  { %1935 = vrot.lane.b32.xlu0 %v3037_v45, %s3139_s3  ;;  %v2464_v45 = vld [vmem:[%s3607_s8] ss:$0 sm:$0xff] }
0x1e6a   :  { %v3039_v10 = vpop.eup %3038 }
0x1e6b   :  { %v1929_v34 = vadd.f32 1.0, %v3039_v10 }
0x1e6d   :  { %3040 = vrcp.f32 %v1929_v34 }
0x1e77   :  { %v3041_v35 = vpop.eup %3040 }
0x1e78   :  { %v1933_v48 = vmul.f32 %v3041_v35, %v1840_v30  ;;  %v2247_v30 = vld [vmem:[%s3608_s9] sm:$0xff] }
0x1e79   :  { %v2879_v0 = vpack.c.bf16 %v2248_v31, %v2247_v30 }
0x1edb   :  { %v1936_v37 = vpop.permute.xlu0 %1935 }
0x1edc   :  { %v1938_v38 = vmul.f32 %v3041_v35, %v1936_v37  ;;  %v2333_v37 = vld [vmem:[%s3610_s11 + $0x8] sm:$0xff] }
0x1ede   :  { %1940 = vrot.lane.b32.xlu1 %v1938_v38, %s3142_s2 }
0x1f50   :  { %v1941_v39 = vpop.permute.xlu1 %1940 }
0x1f51   :  { %v1943_v40 = vadd.f32 %v1941_v39, %v1933_v48  ;;  %v2466_v48 = vld [vmem:[%s3609_s10] ss:$0 sm:$0xff] }
0x1f53   :  { %3042 = vtanh.f32 %v1943_v40 }
0x1f5d   :  { %v3043_v41 = vpop.eup %3042 }
0x1f5e   :  { %1946 = vrot.lane.b32.xlu0 %v3043_v41, %s3139_s3 }
0x1fd0   :  { %v1947_v42 = vpop.permute.xlu0 %1946 }
0x1fd1   :  { %v1949_v43 = vmul.f32 %v3041_v35, %v1947_v42 }
0x1fd3   :  { %1951 = vrot.lane.b32.xlu1 %v1949_v43, %s3142_s2  ;;  %v2468_v43 = vld [vmem:[#allocation6] ss:$0 sm:$0xff] }
0x2045   :  { %v1952_v46 = vpop.permute.xlu1 %1951 }
0x2046   :  { %1954 = vst.msk [vmem:[#allocation5 + $0x5] sm:$0x1] %vm1438_vm3, %v1952_v46  ;;  %2626 = vmatmul.mubr.msk.f32.vlgmr.msra.gmra.mrb[16].mxu0 %vm1336_vm4, %v1952_v46 }
0x2047   :  { %2647 = vmatprep.mubr.msk.f32.mxu0 %vm3141_vm2, %v3137_v1  ;;  %2874 = vmatpush3.bf16.msra.mxu0 %v2873_v26 }
0x2048   :  { %2875 = vmatprep.subr.bf16.mxu0 %v3140_v33 }
0x204b   :  { %2877 = vmatpush3.bf16.msra.mxu0 %v2876_v29 }
0x204c   :  { %2884 = vmatprep.subr.bf16.mxu0 %v3140_v33 }
0x2119   :  { %v2024_v50 = vpop.f32.mrb[16].mxu0 }
0x211a   :  { %v2028_v51 = vadd.f32 %v2024_v50, %v1955_v47  ;;  %v2627_v52 = vpop.f32.mrb[17].mxu0 }
0x211c   :  { %3044 = vtanh.f32 %v2028_v51  ;;  %v2461_v54 = vmul.f32 -1.442695, %v2028_v51 }
0x211e   :  { %3046 = vpow2.f32 %v2461_v54 }
0x2126   :  { %v3045_v53 = vpop.eup %3044 }
0x2127   :  { %2038 = vrot.lane.b32.xlu0 %v3045_v53, %s3139_s3 }
0x2128   :  { %v3047_v55 = vpop.eup %3046 }
0x2129   :  { %v2032_v56 = vadd.f32 1.0, %v3047_v55 }
0x212b   :  { %3048 = vrcp.f32 %v2032_v56 }
0x2135   :  { %v3049_v57 = vpop.eup %3048 }
0x2136   :  { %v2036_v60 = vmul.f32 %v3049_v57, %v1943_v40 }
0x2199   :  { %v2039_v58 = vpop.permute.xlu0 %2038 }
0x219a   :  { %v2041_v59 = vmul.f32 %v3049_v57, %v2039_v58 }
0x219c   :  { %2043 = vrot.lane.b32.xlu1 %v2041_v59, %s3142_s2 }
0x220e   :  { %v2044_v61 = vpop.permute.xlu1 %2043 }
0x220f   :  { %v2046_v62 = vadd.f32 %v2044_v61, %v2036_v60 }
0x2211   :  { %3050 = vtanh.f32 %v2046_v62 }
0x221b   :  { %v3051_v63 = vpop.eup %3050 }
0x221c   :  { %2049 = vrot.lane.b32.xlu0 %v3051_v63, %s3139_s3 }
0x228e   :  { %v2050_v2 = vpop.permute.xlu0 %2049 }
0x228f   :  { %v2052_v3 = vmul.f32 %v3049_v57, %v2050_v2 }
0x2291   :  { %2054 = vrot.lane.b32.xlu1 %v2052_v3, %s3142_s2 }
0x2303   :  { %v2055_v4 = vpop.permute.xlu1 %2054 }
0x2304   :  { %2057 = vst.msk [vmem:[#allocation5 + $0x6] sm:$0x1] %vm1438_vm3, %v2055_v4  ;;  %2637 = vmatmul.mubr.msk.f32.vlgmr.msra.gmra.mrb[16].mxu1 %vm1336_vm4, %v2055_v4 }
0x2305   :  { %2658 = vmatprep.mubr.msk.f32.mxu1 %vm3141_vm2, %v3137_v1  ;;  %2880 = vmatpush3.bf16.msra.mxu1 %v2879_v0 }
0x2306   :  { %2881 = vmatprep.subr.bf16.mxu1 %v3140_v33  ;;  %v2882_v33 = vpack.c.bf16 %v2250_v44, %v2249_v36 }
0x2309   :  { %2883 = vmatpush3.bf16.msra.mxu1 %v2882_v33 }
0x23d7   :  { %v2127_v6 = vpop.f32.mrb[16].mxu1 }
0x23d8   :  { %v2131_v7 = vadd.f32 %v2127_v6, %v2058_v5  ;;  %v2638_v8 = vpop.f32.mrb[17].mxu1 }
0x23da   :  { %3052 = vtanh.f32 %v2131_v7  ;;  %v2463_v11 = vmul.f32 -1.442695, %v2131_v7 }
0x23dc   :  { %3054 = vpow2.f32 %v2463_v11 }
0x23e4   :  { %v3053_v9 = vpop.eup %3052 }
0x23e5   :  { %2141 = vrot.lane.b32.xlu0 %v3053_v9, %s3139_s3 }
0x23e6   :  { %v3055_v12 = vpop.eup %3054 }
0x23e7   :  { %v2135_v13 = vadd.f32 1.0, %v3055_v12 }
0x23e9   :  { %3056 = vrcp.f32 %v2135_v13 }
0x23f3   :  { %v3057_v14 = vpop.eup %3056 }
0x23f4   :  { %v2139_v17 = vmul.f32 %v3057_v14, %v2046_v62 }
0x2457   :  { %v2142_v15 = vpop.permute.xlu0 %2141 }
0x2458   :  { %v2144_v16 = vmul.f32 %v3057_v14, %v2142_v15 }
0x245a   :  { %2146 = vrot.lane.b32.xlu1 %v2144_v16, %s3142_s2 }
0x24cc   :  { %v2147_v19 = vpop.permute.xlu1 %2146 }
0x24cd   :  { %v2149_v20 = vadd.f32 %v2147_v19, %v2139_v17 }
0x24cf   :  { %3058 = vtanh.f32 %v2149_v20 }
0x24d9   :  { %v3059_v21 = vpop.eup %3058 }
0x24da   :  { %2152 = vrot.lane.b32.xlu0 %v3059_v21, %s3139_s3 }
0x254c   :  { %v2153_v18 = vpop.permute.xlu0 %2152 }
0x254d   :  { %v2155_v32 = vmul.f32 %v3057_v14, %v2153_v18 }
0x254f   :  { %2157 = vrot.lane.b32.xlu1 %v2155_v32, %s3142_s2 }
0x25c1   :  { %v2158_v23 = vpop.permute.xlu1 %2157 }
0x25c2   :  { %2160 = vst.msk [vmem:[#allocation5 + $0x7] sm:$0x1] %vm1438_vm3, %v2158_v23 }
0x25c9   :  { %v2161_v28 = vld [vmem:[#allocation5] sm:$0xff] }
0x25ca   :  { %2648 = vmatmul.mubr.msk.f32.vlgmr.msra.gmra.mrb[18].mxu0 %vm1336_vm4, %v2161_v28 }
0x25cb   :  { %2665 = vmatprep.mubr.msk.f32.mxu0 %vm3141_vm2, %v3137_v1  ;;  %v2332_v1 = vld [vmem:[%s3610_s11] sm:$0xff] }
0x25cc   :  { %v2885_v38 = vpack.c.bf16 %v2333_v37, %v2332_v1 }
0x25ce   :  { %2886 = vmatpush3.bf16.msra.mxu0 %v2885_v38 }
0x269d   :  { %v2242_v49 = vpop.f32.mrb[18].mxu0 }
0x269e   :  { %v2243_v10 = vadd.f32 %v2464_v45, %v2242_v49  ;;  %v2649_v34 = vpop.f32.mrb[19].mxu0 }
0x26a0   :  { %v2246_v35 = vmax.f32 %v2243_v10, 0.0 }
0x26a2   :  { %2659 = vmatmul.mubr.msk.f32.vlgmr.msra.gmra.mrb[18].mxu1 %vm1336_vm4, %v2246_v35 }
0x2775   :  { %v2327_v39 = vpop.f32.mrb[18].mxu1 }
0x2776   :  { %v2328_v40 = vadd.f32 %v2466_v48, %v2327_v39  ;;  %v2660_v41 = vpop.f32.mrb[19].mxu1 }
0x2778   :  { %v2331_v42 = vmax.f32 %v2328_v40, 0.0 }
0x277a   :  { %2666 = vmatmul.mubr.msk.f32.vlgmr.msra.gmra.mrb[20].mxu0 %vm2341_vm5, %v2331_v42 }
0x284d   :  { %v2411_v46 = vpop.f32.mrb[20].mxu0 }
0x284e   :  { %v2412_v47 = vadd.f32 %v2468_v43, %v2411_v46  ;;  %v2667_v50 = vpop.f32.mrb[21].mxu0 }
0x2850   :  { %2416 = vst.msk [vmem:[%s3612_s13] sm:$0xff] %vm2415_vm6, %v2412_v47 }
0x2851   :  { %2421 = vsyncpa [#allocation8], 1 }
0x2852   :  { %2422 = vsyncpa [#allocation10], 1 }

</bundles_post_ra>
